<compile_context>
chip_gen: v7x
topology: tpu7x:2x2x1
jax: 0.10.0
libtpu: 0.0.40
codegen_flags: <defaults>
</compile_context>

<pallas_src>
from functools import partial

import jax
import jax.numpy as jnp
from jax.experimental import pallas as pl
from jax.experimental.pallas import tpu as pltpu


C_PAD = 128  # lane-dense padded class dimension (20 -> 128)


def bag_of_ngrams_kernel(data_ref, len_ref, wf_ref, b_ref, out_ref):
    """data_ref: (B_pad, L) int32 SMEM; len_ref: (B_pad, 1) int32 SMEM;
    wf_ref: (V, C_PAD) bf16 VMEM; b_ref: (1, C_PAD) f32 VMEM;
    out_ref: (B_pad, C_PAD) f32 VMEM."""
    B_pad, L = data_ref.shape
    V = wf_ref.shape[0]

    # Bag-of-ngram counts: counts[b, v] = #{l : data[b, l] == v, v != 0}.
    # Token ids are scalar SMEM reads; each compare is a (1, V) lane vector
    # against a broadcast scalar (VPU), no XLU traffic.  B_pad and L are tiny
    # and static, so the Python loops fully unroll.
    lane_iota = jax.lax.broadcasted_iota(jnp.int32, (1, V), 1)
    count_rows = []
    scale_rows = []
    for bi in range(B_pad):
        inv_len = 1.0 / len_ref[bi, 0].astype(jnp.float32)
        scale_rows.append(jnp.full((1, 1), inv_len, jnp.float32))
        row = jnp.zeros((1, V), jnp.float32)
        for l in range(L):
            tok = data_ref[bi, l]                       # scalar int32 (SMEM)
            hit = jnp.logical_and(lane_iota == tok, tok != 0)  # padding_idx=0
            row = row + hit.astype(jnp.float32)
        count_rows.append(row)
    counts = jnp.concatenate(count_rows, axis=0)        # (B_pad, V) exact ints
    scale = jnp.concatenate(scale_rows, axis=0)         # (B_pad, 1) f32

    # Single fused MXU matmul (bf16 operands, f32 accumulation), then the
    # per-row length scale and bias on the small (B_pad, C_PAD) output.
    acc = jnp.dot(counts.astype(wf_ref.dtype), wf_ref[...],
                  preferred_element_type=jnp.float32)
    out_ref[...] = acc * scale + b_ref[...]


def make_fused_params(emb_table, w, b, weight_dtype=jnp.bfloat16, c_pad=C_PAD):
    """Model-load-time step: fuse, pad and cast the parameters ONCE."""
    V, _ = emb_table.shape
    C = w.shape[1]
    w_fused = jnp.dot(emb_table.astype(jnp.float32), w.astype(jnp.float32),
                      preferred_element_type=jnp.float32)          # (V, C)
    w_fused_p = (jnp.zeros((V, c_pad), weight_dtype)
                 .at[:, :C].set(w_fused.astype(weight_dtype)))
    b_p = (jnp.zeros((1, c_pad), jnp.float32)
           .at[:, :C].set(b.reshape(1, C).astype(jnp.float32)))
    return w_fused_p, b_p


@partial(jax.jit, static_argnames=("n_classes",))
def bag_of_ngrams_fused(data, length, w_fused_p, b_p, *, n_classes):
    """data: (B, L) int; length: (B,) int; w_fused_p: (V, C_PAD) bf16;
    b_p: (1, C_PAD) f32.  Returns (B, n_classes) f32."""
    B, L = data.shape
    V, c_pad = w_fused_p.shape

    # Round batch rows up to a sublane multiple of 8 (unmasked stores, and
    # the natural stepping stone to real batch tiling).  Padded rows use
    # token 0 (ignored) and length 1 (avoids inf/NaN); they are sliced away.
    B_pad = max(8, ((B + 7) // 8) * 8)
    data_p = jnp.zeros((B_pad, L), jnp.int32).at[:B].set(data.astype(jnp.int32))
    len_p = jnp.ones((B_pad, 1), jnp.int32).at[:B, 0].set(length.astype(jnp.int32))

    out_p = pl.pallas_call(
        bag_of_ngrams_kernel,
        out_shape=jax.ShapeDtypeStruct((B_pad, c_pad), jnp.float32),
        grid_spec=pl.GridSpec(
            grid=(1,),
            in_specs=[
                pl.BlockSpec(memory_space=pltpu.MemorySpace.SMEM),   # token ids
                pl.BlockSpec(memory_space=pltpu.MemorySpace.SMEM),   # lengths
                pl.BlockSpec((V, c_pad), lambda i: (0, 0)),          # fused weights
                pl.BlockSpec((1, c_pad), lambda i: (0, 0)),          # bias
            ],
            out_specs=pl.BlockSpec((B_pad, c_pad), lambda i: (0, 0)),
        ),
        compiler_params=pltpu.CompilerParams(
            dimension_semantics=("arbitrary",),
        ),
    )(data_p, len_p, w_fused_p, b_p)

    return out_p[:B, :n_classes]


def reference(data, length, emb_table, w, b):
    """Float32 reference matching the PyTorch module."""
    out = emb_table[data]                      # (B, L, E) gather
    out = out.sum(axis=1)                      # (B, E)
    out = out / length.reshape(-1, 1).astype(jnp.float32)
    return out @ w + b.reshape(1, -1)


if __name__ == "__main__":
    vocab_size = 64
    emb_dim = 100
    n_classes = 20
    B, L = 2, 8

    key = jax.random.PRNGKey(0)
    k_emb, k_w, k_b, k_data = jax.random.split(key, 4)

    # Deterministic parameter init (nn.Embedding ~ N(0,1); row 0 zeroed for
    # padding_idx=0; nn.Linear ~ U(-1/sqrt(E), 1/sqrt(E))).
    emb_table = jax.random.normal(k_emb, (vocab_size, emb_dim), jnp.float32)
    emb_table = emb_table.at[0].set(0.0)
    bound = 1.0 / (emb_dim ** 0.5)
    w = jax.random.uniform(k_w, (emb_dim, n_classes), jnp.float32, -bound, bound)
    b = jax.random.uniform(k_b, (n_classes,), jnp.float32, -bound, bound)

    # Example input: padded token-id matrix (0 = padding) + lengths.
    lengths = jnp.array([8, 5], dtype=jnp.int32)
    data = jax.random.randint(k_data, (B, L), 1, vocab_size, dtype=jnp.int32)
    pad_mask = jnp.arange(L)[None, :] < lengths[:, None]
    data = jnp.where(pad_mask, data, 0)

    # "Model load": fuse + pad + bf16-cast parameters once, off the call path.
    w_fused_p, b_p = jax.block_until_ready(make_fused_params(emb_table, w, b))

    out = bag_of_ngrams_fused(data, lengths, w_fused_p, b_p, n_classes=n_classes)
    out = jax.block_until_ready(out)

    # Tight check through the same bf16 fused weights (isolates kernel logic
    # from the bf16 parameter cast).
    onehot = jnp.logical_and(
        data[:, :, None] == jnp.arange(vocab_size)[None, None, :],
        (data != 0)[:, :, None])
    counts_ref = onehot.astype(jnp.float32).sum(axis=1)               # (B, V)
    ref_bf16 = (counts_ref @ w_fused_p[:, :n_classes].astype(jnp.float32)
                ) / lengths[:, None].astype(jnp.float32) + b.reshape(1, -1)

    # Looser check vs the full-f32 PyTorch-equivalent reference (the only
    # difference is the bf16 rounding of the fused weights).
    ref_f32 = reference(data, lengths, emb_table, w, b)

    assert out.shape == (B, n_classes)
    assert jnp.allclose(out, ref_bf16, atol=1e-5, rtol=1e-5), "kernel logic mismatch"
    assert jnp.allclose(out, ref_f32, atol=5e-3, rtol=5e-3), "mismatch vs f32 reference"

    print("KERNEL_OK")
</pallas_src>

<mosaic_0001>
module attributes {stable_mosaic.version = 11 : i64} {
  func.func @bag_of_ngrams_kernel(%arg0: i32, %arg1: memref<8x8xi32, #tpu.memory_space<smem>>, %arg2: memref<8x1xi32, #tpu.memory_space<smem>>, %arg3: memref<64x128xbf16, #tpu.memory_space<vmem>>, %arg4: memref<1x128xf32, #tpu.memory_space<vmem>>, %arg5: memref<8x128xf32, #tpu.memory_space<vmem>>) attributes {dimension_semantics = [#tpu.dimension_semantics<arbitrary>], iteration_bounds = array<i64: 1>, scalar_prefetch = 0 : i64, scratch_operands = 0 : i64, tpu.core_type = #tpu.core_type<tc>, window_params = [{transform_indices = @transform_0, window_bounds = array<i64: 8, 8>}, {transform_indices = @transform_1, window_bounds = array<i64: 8, 1>}, {pipeline_mode = #tpu.pipeline_mode<synchronous>, transform_indices = @transform_2, window_bounds = array<i64: 64, 128>}, {pipeline_mode = #tpu.pipeline_mode<synchronous>, transform_indices = @transform_3, window_bounds = array<i64: 1, 128>}, {pipeline_mode = #tpu.pipeline_mode<synchronous>, transform_indices = @transform_4, window_bounds = array<i64: 8, 128>}]} {
    %0 = tpu.iota {dimensions = array<i32: 1>} : vector<1x64xi32>
    %c0 = arith.constant 0 : index
    %c0_0 = arith.constant 0 : index
    %1 = memref.load %arg2[%c0, %c0_0] : memref<8x1xi32, #tpu.memory_space<smem>>
    %2 = arith.sitofp %1 : i32 to f32
    %cst = arith.constant 1.000000e+00 : f32
    %3 = arith.divf %cst, %2 : f32
    %4 = vector.broadcast %3 : f32 to vector<1x1xf32>
    %cst_1 = arith.constant 0.000000e+00 : f32
    %5 = vector.broadcast %cst_1 : f32 to vector<1x64xf32>
    %c0_2 = arith.constant 0 : index
    %c0_3 = arith.constant 0 : index
    %6 = memref.load %arg1[%c0_2, %c0_3] : memref<8x8xi32, #tpu.memory_space<smem>>
    %7 = vector.broadcast %6 : i32 to vector<1x64xi32>
    %8 = arith.cmpi eq, %0, %7 : vector<1x64xi32>
    %c0_i32 = arith.constant 0 : i32
    %9 = arith.cmpi ne, %6, %c0_i32 : i32
    %10 = vector.broadcast %9 : i1 to vector<1x64xi1>
    %11 = arith.andi %8, %10 : vector<1x64xi1>
    %12 = arith.extui %11 : vector<1x64xi1> to vector<1x64xi32>
    %13 = arith.sitofp %12 : vector<1x64xi32> to vector<1x64xf32>
    %14 = arith.addf %5, %13 : vector<1x64xf32>
    %c0_4 = arith.constant 0 : index
    %c1 = arith.constant 1 : index
    %15 = memref.load %arg1[%c0_4, %c1] : memref<8x8xi32, #tpu.memory_space<smem>>
    %16 = vector.broadcast %15 : i32 to vector<1x64xi32>
    %17 = arith.cmpi eq, %0, %16 : vector<1x64xi32>
    %c0_i32_5 = arith.constant 0 : i32
    %18 = arith.cmpi ne, %15, %c0_i32_5 : i32
    %19 = vector.broadcast %18 : i1 to vector<1x64xi1>
    %20 = arith.andi %17, %19 : vector<1x64xi1>
    %21 = arith.extui %20 : vector<1x64xi1> to vector<1x64xi32>
    %22 = arith.sitofp %21 : vector<1x64xi32> to vector<1x64xf32>
    %23 = arith.addf %14, %22 : vector<1x64xf32>
    %c0_6 = arith.constant 0 : index
    %c2 = arith.constant 2 : index
    %24 = memref.load %arg1[%c0_6, %c2] : memref<8x8xi32, #tpu.memory_space<smem>>
    %25 = vector.broadcast %24 : i32 to vector<1x64xi32>
    %26 = arith.cmpi eq, %0, %25 : vector<1x64xi32>
    %c0_i32_7 = arith.constant 0 : i32
    %27 = arith.cmpi ne, %24, %c0_i32_7 : i32
    %28 = vector.broadcast %27 : i1 to vector<1x64xi1>
    %29 = arith.andi %26, %28 : vector<1x64xi1>
    %30 = arith.extui %29 : vector<1x64xi1> to vector<1x64xi32>
    %31 = arith.sitofp %30 : vector<1x64xi32> to vector<1x64xf32>
    %32 = arith.addf %23, %31 : vector<1x64xf32>
    %c0_8 = arith.constant 0 : index
    %c3 = arith.constant 3 : index
    %33 = memref.load %arg1[%c0_8, %c3] : memref<8x8xi32, #tpu.memory_space<smem>>
    %34 = vector.broadcast %33 : i32 to vector<1x64xi32>
    %35 = arith.cmpi eq, %0, %34 : vector<1x64xi32>
    %c0_i32_9 = arith.constant 0 : i32
    %36 = arith.cmpi ne, %33, %c0_i32_9 : i32
    %37 = vector.broadcast %36 : i1 to vector<1x64xi1>
    %38 = arith.andi %35, %37 : vector<1x64xi1>
    %39 = arith.extui %38 : vector<1x64xi1> to vector<1x64xi32>
    %40 = arith.sitofp %39 : vector<1x64xi32> to vector<1x64xf32>
    %41 = arith.addf %32, %40 : vector<1x64xf32>
    %c0_10 = arith.constant 0 : index
    %c4 = arith.constant 4 : index
    %42 = memref.load %arg1[%c0_10, %c4] : memref<8x8xi32, #tpu.memory_space<smem>>
    %43 = vector.broadcast %42 : i32 to vector<1x64xi32>
    %44 = arith.cmpi eq, %0, %43 : vector<1x64xi32>
    %c0_i32_11 = arith.constant 0 : i32
    %45 = arith.cmpi ne, %42, %c0_i32_11 : i32
    %46 = vector.broadcast %45 : i1 to vector<1x64xi1>
    %47 = arith.andi %44, %46 : vector<1x64xi1>
    %48 = arith.extui %47 : vector<1x64xi1> to vector<1x64xi32>
    %49 = arith.sitofp %48 : vector<1x64xi32> to vector<1x64xf32>
    %50 = arith.addf %41, %49 : vector<1x64xf32>
    %c0_12 = arith.constant 0 : index
    %c5 = arith.constant 5 : index
    %51 = memref.load %arg1[%c0_12, %c5] : memref<8x8xi32, #tpu.memory_space<smem>>
    %52 = vector.broadcast %51 : i32 to vector<1x64xi32>
    %53 = arith.cmpi eq, %0, %52 : vector<1x64xi32>
    %c0_i32_13 = arith.constant 0 : i32
    %54 = arith.cmpi ne, %51, %c0_i32_13 : i32
    %55 = vector.broadcast %54 : i1 to vector<1x64xi1>
    %56 = arith.andi %53, %55 : vector<1x64xi1>
    %57 = arith.extui %56 : vector<1x64xi1> to vector<1x64xi32>
    %58 = arith.sitofp %57 : vector<1x64xi32> to vector<1x64xf32>
    %59 = arith.addf %50, %58 : vector<1x64xf32>
    %c0_14 = arith.constant 0 : index
    %c6 = arith.constant 6 : index
    %60 = memref.load %arg1[%c0_14, %c6] : memref<8x8xi32, #tpu.memory_space<smem>>
    %61 = vector.broadcast %60 : i32 to vector<1x64xi32>
    %62 = arith.cmpi eq, %0, %61 : vector<1x64xi32>
    %c0_i32_15 = arith.constant 0 : i32
    %63 = arith.cmpi ne, %60, %c0_i32_15 : i32
    %64 = vector.broadcast %63 : i1 to vector<1x64xi1>
    %65 = arith.andi %62, %64 : vector<1x64xi1>
    %66 = arith.extui %65 : vector<1x64xi1> to vector<1x64xi32>
    %67 = arith.sitofp %66 : vector<1x64xi32> to vector<1x64xf32>
    %68 = arith.addf %59, %67 : vector<1x64xf32>
    %c0_16 = arith.constant 0 : index
    %c7 = arith.constant 7 : index
    %69 = memref.load %arg1[%c0_16, %c7] : memref<8x8xi32, #tpu.memory_space<smem>>
    %70 = vector.broadcast %69 : i32 to vector<1x64xi32>
    %71 = arith.cmpi eq, %0, %70 : vector<1x64xi32>
    %c0_i32_17 = arith.constant 0 : i32
    %72 = arith.cmpi ne, %69, %c0_i32_17 : i32
    %73 = vector.broadcast %72 : i1 to vector<1x64xi1>
    %74 = arith.andi %71, %73 : vector<1x64xi1>
    %75 = arith.extui %74 : vector<1x64xi1> to vector<1x64xi32>
    %76 = arith.sitofp %75 : vector<1x64xi32> to vector<1x64xf32>
    %77 = arith.addf %68, %76 : vector<1x64xf32>
    %c1_18 = arith.constant 1 : index
    %c0_19 = arith.constant 0 : index
    %78 = memref.load %arg2[%c1_18, %c0_19] : memref<8x1xi32, #tpu.memory_space<smem>>
    %79 = arith.sitofp %78 : i32 to f32
    %cst_20 = arith.constant 1.000000e+00 : f32
    %80 = arith.divf %cst_20, %79 : f32
    %81 = vector.broadcast %80 : f32 to vector<1x1xf32>
    %cst_21 = arith.constant 0.000000e+00 : f32
    %82 = vector.broadcast %cst_21 : f32 to vector<1x64xf32>
    %c1_22 = arith.constant 1 : index
    %c0_23 = arith.constant 0 : index
    %83 = memref.load %arg1[%c1_22, %c0_23] : memref<8x8xi32, #tpu.memory_space<smem>>
    %84 = vector.broadcast %83 : i32 to vector<1x64xi32>
    %85 = arith.cmpi eq, %0, %84 : vector<1x64xi32>
    %c0_i32_24 = arith.constant 0 : i32
    %86 = arith.cmpi ne, %83, %c0_i32_24 : i32
    %87 = vector.broadcast %86 : i1 to vector<1x64xi1>
    %88 = arith.andi %85, %87 : vector<1x64xi1>
    %89 = arith.extui %88 : vector<1x64xi1> to vector<1x64xi32>
    %90 = arith.sitofp %89 : vector<1x64xi32> to vector<1x64xf32>
    %91 = arith.addf %82, %90 : vector<1x64xf32>
    %c1_25 = arith.constant 1 : index
    %c1_26 = arith.constant 1 : index
    %92 = memref.load %arg1[%c1_25, %c1_26] : memref<8x8xi32, #tpu.memory_space<smem>>
    %93 = vector.broadcast %92 : i32 to vector<1x64xi32>
    %94 = arith.cmpi eq, %0, %93 : vector<1x64xi32>
    %c0_i32_27 = arith.constant 0 : i32
    %95 = arith.cmpi ne, %92, %c0_i32_27 : i32
    %96 = vector.broadcast %95 : i1 to vector<1x64xi1>
    %97 = arith.andi %94, %96 : vector<1x64xi1>
    %98 = arith.extui %97 : vector<1x64xi1> to vector<1x64xi32>
    %99 = arith.sitofp %98 : vector<1x64xi32> to vector<1x64xf32>
    %100 = arith.addf %91, %99 : vector<1x64xf32>
    %c1_28 = arith.constant 1 : index
    %c2_29 = arith.constant 2 : index
    %101 = memref.load %arg1[%c1_28, %c2_29] : memref<8x8xi32, #tpu.memory_space<smem>>
    %102 = vector.broadcast %101 : i32 to vector<1x64xi32>
    %103 = arith.cmpi eq, %0, %102 : vector<1x64xi32>
    %c0_i32_30 = arith.constant 0 : i32
    %104 = arith.cmpi ne, %101, %c0_i32_30 : i32
    %105 = vector.broadcast %104 : i1 to vector<1x64xi1>
    %106 = arith.andi %103, %105 : vector<1x64xi1>
    %107 = arith.extui %106 : vector<1x64xi1> to vector<1x64xi32>
    %108 = arith.sitofp %107 : vector<1x64xi32> to vector<1x64xf32>
    %109 = arith.addf %100, %108 : vector<1x64xf32>
    %c1_31 = arith.constant 1 : index
    %c3_32 = arith.constant 3 : index
    %110 = memref.load %arg1[%c1_31, %c3_32] : memref<8x8xi32, #tpu.memory_space<smem>>
    %111 = vector.broadcast %110 : i32 to vector<1x64xi32>
    %112 = arith.cmpi eq, %0, %111 : vector<1x64xi32>
    %c0_i32_33 = arith.constant 0 : i32
    %113 = arith.cmpi ne, %110, %c0_i32_33 : i32
    %114 = vector.broadcast %113 : i1 to vector<1x64xi1>
    %115 = arith.andi %112, %114 : vector<1x64xi1>
    %116 = arith.extui %115 : vector<1x64xi1> to vector<1x64xi32>
    %117 = arith.sitofp %116 : vector<1x64xi32> to vector<1x64xf32>
    %118 = arith.addf %109, %117 : vector<1x64xf32>
    %c1_34 = arith.constant 1 : index
    %c4_35 = arith.constant 4 : index
    %119 = memref.load %arg1[%c1_34, %c4_35] : memref<8x8xi32, #tpu.memory_space<smem>>
    %120 = vector.broadcast %119 : i32 to vector<1x64xi32>
    %121 = arith.cmpi eq, %0, %120 : vector<1x64xi32>
    %c0_i32_36 = arith.constant 0 : i32
    %122 = arith.cmpi ne, %119, %c0_i32_36 : i32
    %123 = vector.broadcast %122 : i1 to vector<1x64xi1>
    %124 = arith.andi %121, %123 : vector<1x64xi1>
    %125 = arith.extui %124 : vector<1x64xi1> to vector<1x64xi32>
    %126 = arith.sitofp %125 : vector<1x64xi32> to vector<1x64xf32>
    %127 = arith.addf %118, %126 : vector<1x64xf32>
    %c1_37 = arith.constant 1 : index
    %c5_38 = arith.constant 5 : index
    %128 = memref.load %arg1[%c1_37, %c5_38] : memref<8x8xi32, #tpu.memory_space<smem>>
    %129 = vector.broadcast %128 : i32 to vector<1x64xi32>
    %130 = arith.cmpi eq, %0, %129 : vector<1x64xi32>
    %c0_i32_39 = arith.constant 0 : i32
    %131 = arith.cmpi ne, %128, %c0_i32_39 : i32
    %132 = vector.broadcast %131 : i1 to vector<1x64xi1>
    %133 = arith.andi %130, %132 : vector<1x64xi1>
    %134 = arith.extui %133 : vector<1x64xi1> to vector<1x64xi32>
    %135 = arith.sitofp %134 : vector<1x64xi32> to vector<1x64xf32>
    %136 = arith.addf %127, %135 : vector<1x64xf32>
    %c1_40 = arith.constant 1 : index
    %c6_41 = arith.constant 6 : index
    %137 = memref.load %arg1[%c1_40, %c6_41] : memref<8x8xi32, #tpu.memory_space<smem>>
    %138 = vector.broadcast %137 : i32 to vector<1x64xi32>
    %139 = arith.cmpi eq, %0, %138 : vector<1x64xi32>
    %c0_i32_42 = arith.constant 0 : i32
    %140 = arith.cmpi ne, %137, %c0_i32_42 : i32
    %141 = vector.broadcast %140 : i1 to vector<1x64xi1>
    %142 = arith.andi %139, %141 : vector<1x64xi1>
    %143 = arith.extui %142 : vector<1x64xi1> to vector<1x64xi32>
    %144 = arith.sitofp %143 : vector<1x64xi32> to vector<1x64xf32>
    %145 = arith.addf %136, %144 : vector<1x64xf32>
    %c1_43 = arith.constant 1 : index
    %c7_44 = arith.constant 7 : index
    %146 = memref.load %arg1[%c1_43, %c7_44] : memref<8x8xi32, #tpu.memory_space<smem>>
    %147 = vector.broadcast %146 : i32 to vector<1x64xi32>
    %148 = arith.cmpi eq, %0, %147 : vector<1x64xi32>
    %c0_i32_45 = arith.constant 0 : i32
    %149 = arith.cmpi ne, %146, %c0_i32_45 : i32
    %150 = vector.broadcast %149 : i1 to vector<1x64xi1>
    %151 = arith.andi %148, %150 : vector<1x64xi1>
    %152 = arith.extui %151 : vector<1x64xi1> to vector<1x64xi32>
    %153 = arith.sitofp %152 : vector<1x64xi32> to vector<1x64xf32>
    %154 = arith.addf %145, %153 : vector<1x64xf32>
    %c2_46 = arith.constant 2 : index
    %c0_47 = arith.constant 0 : index
    %155 = memref.load %arg2[%c2_46, %c0_47] : memref<8x1xi32, #tpu.memory_space<smem>>
    %156 = arith.sitofp %155 : i32 to f32
    %cst_48 = arith.constant 1.000000e+00 : f32
    %157 = arith.divf %cst_48, %156 : f32
    %158 = vector.broadcast %157 : f32 to vector<1x1xf32>
    %cst_49 = arith.constant 0.000000e+00 : f32
    %159 = vector.broadcast %cst_49 : f32 to vector<1x64xf32>
    %c2_50 = arith.constant 2 : index
    %c0_51 = arith.constant 0 : index
    %160 = memref.load %arg1[%c2_50, %c0_51] : memref<8x8xi32, #tpu.memory_space<smem>>
    %161 = vector.broadcast %160 : i32 to vector<1x64xi32>
    %162 = arith.cmpi eq, %0, %161 : vector<1x64xi32>
    %c0_i32_52 = arith.constant 0 : i32
    %163 = arith.cmpi ne, %160, %c0_i32_52 : i32
    %164 = vector.broadcast %163 : i1 to vector<1x64xi1>
    %165 = arith.andi %162, %164 : vector<1x64xi1>
    %166 = arith.extui %165 : vector<1x64xi1> to vector<1x64xi32>
    %167 = arith.sitofp %166 : vector<1x64xi32> to vector<1x64xf32>
    %168 = arith.addf %159, %167 : vector<1x64xf32>
    %c2_53 = arith.constant 2 : index
    %c1_54 = arith.constant 1 : index
    %169 = memref.load %arg1[%c2_53, %c1_54] : memref<8x8xi32, #tpu.memory_space<smem>>
    %170 = vector.broadcast %169 : i32 to vector<1x64xi32>
    %171 = arith.cmpi eq, %0, %170 : vector<1x64xi32>
    %c0_i32_55 = arith.constant 0 : i32
    %172 = arith.cmpi ne, %169, %c0_i32_55 : i32
    %173 = vector.broadcast %172 : i1 to vector<1x64xi1>
    %174 = arith.andi %171, %173 : vector<1x64xi1>
    %175 = arith.extui %174 : vector<1x64xi1> to vector<1x64xi32>
    %176 = arith.sitofp %175 : vector<1x64xi32> to vector<1x64xf32>
    %177 = arith.addf %168, %176 : vector<1x64xf32>
    %c2_56 = arith.constant 2 : index
    %c2_57 = arith.constant 2 : index
    %178 = memref.load %arg1[%c2_56, %c2_57] : memref<8x8xi32, #tpu.memory_space<smem>>
    %179 = vector.broadcast %178 : i32 to vector<1x64xi32>
    %180 = arith.cmpi eq, %0, %179 : vector<1x64xi32>
    %c0_i32_58 = arith.constant 0 : i32
    %181 = arith.cmpi ne, %178, %c0_i32_58 : i32
    %182 = vector.broadcast %181 : i1 to vector<1x64xi1>
    %183 = arith.andi %180, %182 : vector<1x64xi1>
    %184 = arith.extui %183 : vector<1x64xi1> to vector<1x64xi32>
    %185 = arith.sitofp %184 : vector<1x64xi32> to vector<1x64xf32>
    %186 = arith.addf %177, %185 : vector<1x64xf32>
    %c2_59 = arith.constant 2 : index
    %c3_60 = arith.constant 3 : index
    %187 = memref.load %arg1[%c2_59, %c3_60] : memref<8x8xi32, #tpu.memory_space<smem>>
    %188 = vector.broadcast %187 : i32 to vector<1x64xi32>
    %189 = arith.cmpi eq, %0, %188 : vector<1x64xi32>
    %c0_i32_61 = arith.constant 0 : i32
    %190 = arith.cmpi ne, %187, %c0_i32_61 : i32
    %191 = vector.broadcast %190 : i1 to vector<1x64xi1>
    %192 = arith.andi %189, %191 : vector<1x64xi1>
    %193 = arith.extui %192 : vector<1x64xi1> to vector<1x64xi32>
    %194 = arith.sitofp %193 : vector<1x64xi32> to vector<1x64xf32>
    %195 = arith.addf %186, %194 : vector<1x64xf32>
    %c2_62 = arith.constant 2 : index
    %c4_63 = arith.constant 4 : index
    %196 = memref.load %arg1[%c2_62, %c4_63] : memref<8x8xi32, #tpu.memory_space<smem>>
    %197 = vector.broadcast %196 : i32 to vector<1x64xi32>
    %198 = arith.cmpi eq, %0, %197 : vector<1x64xi32>
    %c0_i32_64 = arith.constant 0 : i32
    %199 = arith.cmpi ne, %196, %c0_i32_64 : i32
    %200 = vector.broadcast %199 : i1 to vector<1x64xi1>
    %201 = arith.andi %198, %200 : vector<1x64xi1>
    %202 = arith.extui %201 : vector<1x64xi1> to vector<1x64xi32>
    %203 = arith.sitofp %202 : vector<1x64xi32> to vector<1x64xf32>
    %204 = arith.addf %195, %203 : vector<1x64xf32>
    %c2_65 = arith.constant 2 : index
    %c5_66 = arith.constant 5 : index
    %205 = memref.load %arg1[%c2_65, %c5_66] : memref<8x8xi32, #tpu.memory_space<smem>>
    %206 = vector.broadcast %205 : i32 to vector<1x64xi32>
    %207 = arith.cmpi eq, %0, %206 : vector<1x64xi32>
    %c0_i32_67 = arith.constant 0 : i32
    %208 = arith.cmpi ne, %205, %c0_i32_67 : i32
    %209 = vector.broadcast %208 : i1 to vector<1x64xi1>
    %210 = arith.andi %207, %209 : vector<1x64xi1>
    %211 = arith.extui %210 : vector<1x64xi1> to vector<1x64xi32>
    %212 = arith.sitofp %211 : vector<1x64xi32> to vector<1x64xf32>
    %213 = arith.addf %204, %212 : vector<1x64xf32>
    %c2_68 = arith.constant 2 : index
    %c6_69 = arith.constant 6 : index
    %214 = memref.load %arg1[%c2_68, %c6_69] : memref<8x8xi32, #tpu.memory_space<smem>>
    %215 = vector.broadcast %214 : i32 to vector<1x64xi32>
    %216 = arith.cmpi eq, %0, %215 : vector<1x64xi32>
    %c0_i32_70 = arith.constant 0 : i32
    %217 = arith.cmpi ne, %214, %c0_i32_70 : i32
    %218 = vector.broadcast %217 : i1 to vector<1x64xi1>
    %219 = arith.andi %216, %218 : vector<1x64xi1>
    %220 = arith.extui %219 : vector<1x64xi1> to vector<1x64xi32>
    %221 = arith.sitofp %220 : vector<1x64xi32> to vector<1x64xf32>
    %222 = arith.addf %213, %221 : vector<1x64xf32>
    %c2_71 = arith.constant 2 : index
    %c7_72 = arith.constant 7 : index
    %223 = memref.load %arg1[%c2_71, %c7_72] : memref<8x8xi32, #tpu.memory_space<smem>>
    %224 = vector.broadcast %223 : i32 to vector<1x64xi32>
    %225 = arith.cmpi eq, %0, %224 : vector<1x64xi32>
    %c0_i32_73 = arith.constant 0 : i32
    %226 = arith.cmpi ne, %223, %c0_i32_73 : i32
    %227 = vector.broadcast %226 : i1 to vector<1x64xi1>
    %228 = arith.andi %225, %227 : vector<1x64xi1>
    %229 = arith.extui %228 : vector<1x64xi1> to vector<1x64xi32>
    %230 = arith.sitofp %229 : vector<1x64xi32> to vector<1x64xf32>
    %231 = arith.addf %222, %230 : vector<1x64xf32>
    %c3_74 = arith.constant 3 : index
    %c0_75 = arith.constant 0 : index
    %232 = memref.load %arg2[%c3_74, %c0_75] : memref<8x1xi32, #tpu.memory_space<smem>>
    %233 = arith.sitofp %232 : i32 to f32
    %cst_76 = arith.constant 1.000000e+00 : f32
    %234 = arith.divf %cst_76, %233 : f32
    %235 = vector.broadcast %234 : f32 to vector<1x1xf32>
    %cst_77 = arith.constant 0.000000e+00 : f32
    %236 = vector.broadcast %cst_77 : f32 to vector<1x64xf32>
    %c3_78 = arith.constant 3 : index
    %c0_79 = arith.constant 0 : index
    %237 = memref.load %arg1[%c3_78, %c0_79] : memref<8x8xi32, #tpu.memory_space<smem>>
    %238 = vector.broadcast %237 : i32 to vector<1x64xi32>
    %239 = arith.cmpi eq, %0, %238 : vector<1x64xi32>
    %c0_i32_80 = arith.constant 0 : i32
    %240 = arith.cmpi ne, %237, %c0_i32_80 : i32
    %241 = vector.broadcast %240 : i1 to vector<1x64xi1>
    %242 = arith.andi %239, %241 : vector<1x64xi1>
    %243 = arith.extui %242 : vector<1x64xi1> to vector<1x64xi32>
    %244 = arith.sitofp %243 : vector<1x64xi32> to vector<1x64xf32>
    %245 = arith.addf %236, %244 : vector<1x64xf32>
    %c3_81 = arith.constant 3 : index
    %c1_82 = arith.constant 1 : index
    %246 = memref.load %arg1[%c3_81, %c1_82] : memref<8x8xi32, #tpu.memory_space<smem>>
    %247 = vector.broadcast %246 : i32 to vector<1x64xi32>
    %248 = arith.cmpi eq, %0, %247 : vector<1x64xi32>
    %c0_i32_83 = arith.constant 0 : i32
    %249 = arith.cmpi ne, %246, %c0_i32_83 : i32
    %250 = vector.broadcast %249 : i1 to vector<1x64xi1>
    %251 = arith.andi %248, %250 : vector<1x64xi1>
    %252 = arith.extui %251 : vector<1x64xi1> to vector<1x64xi32>
    %253 = arith.sitofp %252 : vector<1x64xi32> to vector<1x64xf32>
    %254 = arith.addf %245, %253 : vector<1x64xf32>
    %c3_84 = arith.constant 3 : index
    %c2_85 = arith.constant 2 : index
    %255 = memref.load %arg1[%c3_84, %c2_85] : memref<8x8xi32, #tpu.memory_space<smem>>
    %256 = vector.broadcast %255 : i32 to vector<1x64xi32>
    %257 = arith.cmpi eq, %0, %256 : vector<1x64xi32>
    %c0_i32_86 = arith.constant 0 : i32
    %258 = arith.cmpi ne, %255, %c0_i32_86 : i32
    %259 = vector.broadcast %258 : i1 to vector<1x64xi1>
    %260 = arith.andi %257, %259 : vector<1x64xi1>
    %261 = arith.extui %260 : vector<1x64xi1> to vector<1x64xi32>
    %262 = arith.sitofp %261 : vector<1x64xi32> to vector<1x64xf32>
    %263 = arith.addf %254, %262 : vector<1x64xf32>
    %c3_87 = arith.constant 3 : index
    %c3_88 = arith.constant 3 : index
    %264 = memref.load %arg1[%c3_87, %c3_88] : memref<8x8xi32, #tpu.memory_space<smem>>
    %265 = vector.broadcast %264 : i32 to vector<1x64xi32>
    %266 = arith.cmpi eq, %0, %265 : vector<1x64xi32>
    %c0_i32_89 = arith.constant 0 : i32
    %267 = arith.cmpi ne, %264, %c0_i32_89 : i32
    %268 = vector.broadcast %267 : i1 to vector<1x64xi1>
    %269 = arith.andi %266, %268 : vector<1x64xi1>
    %270 = arith.extui %269 : vector<1x64xi1> to vector<1x64xi32>
    %271 = arith.sitofp %270 : vector<1x64xi32> to vector<1x64xf32>
    %272 = arith.addf %263, %271 : vector<1x64xf32>
    %c3_90 = arith.constant 3 : index
    %c4_91 = arith.constant 4 : index
    %273 = memref.load %arg1[%c3_90, %c4_91] : memref<8x8xi32, #tpu.memory_space<smem>>
    %274 = vector.broadcast %273 : i32 to vector<1x64xi32>
    %275 = arith.cmpi eq, %0, %274 : vector<1x64xi32>
    %c0_i32_92 = arith.constant 0 : i32
    %276 = arith.cmpi ne, %273, %c0_i32_92 : i32
    %277 = vector.broadcast %276 : i1 to vector<1x64xi1>
    %278 = arith.andi %275, %277 : vector<1x64xi1>
    %279 = arith.extui %278 : vector<1x64xi1> to vector<1x64xi32>
    %280 = arith.sitofp %279 : vector<1x64xi32> to vector<1x64xf32>
    %281 = arith.addf %272, %280 : vector<1x64xf32>
    %c3_93 = arith.constant 3 : index
    %c5_94 = arith.constant 5 : index
    %282 = memref.load %arg1[%c3_93, %c5_94] : memref<8x8xi32, #tpu.memory_space<smem>>
    %283 = vector.broadcast %282 : i32 to vector<1x64xi32>
    %284 = arith.cmpi eq, %0, %283 : vector<1x64xi32>
    %c0_i32_95 = arith.constant 0 : i32
    %285 = arith.cmpi ne, %282, %c0_i32_95 : i32
    %286 = vector.broadcast %285 : i1 to vector<1x64xi1>
    %287 = arith.andi %284, %286 : vector<1x64xi1>
    %288 = arith.extui %287 : vector<1x64xi1> to vector<1x64xi32>
    %289 = arith.sitofp %288 : vector<1x64xi32> to vector<1x64xf32>
    %290 = arith.addf %281, %289 : vector<1x64xf32>
    %c3_96 = arith.constant 3 : index
    %c6_97 = arith.constant 6 : index
    %291 = memref.load %arg1[%c3_96, %c6_97] : memref<8x8xi32, #tpu.memory_space<smem>>
    %292 = vector.broadcast %291 : i32 to vector<1x64xi32>
    %293 = arith.cmpi eq, %0, %292 : vector<1x64xi32>
    %c0_i32_98 = arith.constant 0 : i32
    %294 = arith.cmpi ne, %291, %c0_i32_98 : i32
    %295 = vector.broadcast %294 : i1 to vector<1x64xi1>
    %296 = arith.andi %293, %295 : vector<1x64xi1>
    %297 = arith.extui %296 : vector<1x64xi1> to vector<1x64xi32>
    %298 = arith.sitofp %297 : vector<1x64xi32> to vector<1x64xf32>
    %299 = arith.addf %290, %298 : vector<1x64xf32>
    %c3_99 = arith.constant 3 : index
    %c7_100 = arith.constant 7 : index
    %300 = memref.load %arg1[%c3_99, %c7_100] : memref<8x8xi32, #tpu.memory_space<smem>>
    %301 = vector.broadcast %300 : i32 to vector<1x64xi32>
    %302 = arith.cmpi eq, %0, %301 : vector<1x64xi32>
    %c0_i32_101 = arith.constant 0 : i32
    %303 = arith.cmpi ne, %300, %c0_i32_101 : i32
    %304 = vector.broadcast %303 : i1 to vector<1x64xi1>
    %305 = arith.andi %302, %304 : vector<1x64xi1>
    %306 = arith.extui %305 : vector<1x64xi1> to vector<1x64xi32>
    %307 = arith.sitofp %306 : vector<1x64xi32> to vector<1x64xf32>
    %308 = arith.addf %299, %307 : vector<1x64xf32>
    %c4_102 = arith.constant 4 : index
    %c0_103 = arith.constant 0 : index
    %309 = memref.load %arg2[%c4_102, %c0_103] : memref<8x1xi32, #tpu.memory_space<smem>>
    %310 = arith.sitofp %309 : i32 to f32
    %cst_104 = arith.constant 1.000000e+00 : f32
    %311 = arith.divf %cst_104, %310 : f32
    %312 = vector.broadcast %311 : f32 to vector<1x1xf32>
    %cst_105 = arith.constant 0.000000e+00 : f32
    %313 = vector.broadcast %cst_105 : f32 to vector<1x64xf32>
    %c4_106 = arith.constant 4 : index
    %c0_107 = arith.constant 0 : index
    %314 = memref.load %arg1[%c4_106, %c0_107] : memref<8x8xi32, #tpu.memory_space<smem>>
    %315 = vector.broadcast %314 : i32 to vector<1x64xi32>
    %316 = arith.cmpi eq, %0, %315 : vector<1x64xi32>
    %c0_i32_108 = arith.constant 0 : i32
    %317 = arith.cmpi ne, %314, %c0_i32_108 : i32
    %318 = vector.broadcast %317 : i1 to vector<1x64xi1>
    %319 = arith.andi %316, %318 : vector<1x64xi1>
    %320 = arith.extui %319 : vector<1x64xi1> to vector<1x64xi32>
    %321 = arith.sitofp %320 : vector<1x64xi32> to vector<1x64xf32>
    %322 = arith.addf %313, %321 : vector<1x64xf32>
    %c4_109 = arith.constant 4 : index
    %c1_110 = arith.constant 1 : index
    %323 = memref.load %arg1[%c4_109, %c1_110] : memref<8x8xi32, #tpu.memory_space<smem>>
    %324 = vector.broadcast %323 : i32 to vector<1x64xi32>
    %325 = arith.cmpi eq, %0, %324 : vector<1x64xi32>
    %c0_i32_111 = arith.constant 0 : i32
    %326 = arith.cmpi ne, %323, %c0_i32_111 : i32
    %327 = vector.broadcast %326 : i1 to vector<1x64xi1>
    %328 = arith.andi %325, %327 : vector<1x64xi1>
    %329 = arith.extui %328 : vector<1x64xi1> to vector<1x64xi32>
    %330 = arith.sitofp %329 : vector<1x64xi32> to vector<1x64xf32>
    %331 = arith.addf %322, %330 : vector<1x64xf32>
    %c4_112 = arith.constant 4 : index
    %c2_113 = arith.constant 2 : index
    %332 = memref.load %arg1[%c4_112, %c2_113] : memref<8x8xi32, #tpu.memory_space<smem>>
    %333 = vector.broadcast %332 : i32 to vector<1x64xi32>
    %334 = arith.cmpi eq, %0, %333 : vector<1x64xi32>
    %c0_i32_114 = arith.constant 0 : i32
    %335 = arith.cmpi ne, %332, %c0_i32_114 : i32
    %336 = vector.broadcast %335 : i1 to vector<1x64xi1>
    %337 = arith.andi %334, %336 : vector<1x64xi1>
    %338 = arith.extui %337 : vector<1x64xi1> to vector<1x64xi32>
    %339 = arith.sitofp %338 : vector<1x64xi32> to vector<1x64xf32>
    %340 = arith.addf %331, %339 : vector<1x64xf32>
    %c4_115 = arith.constant 4 : index
    %c3_116 = arith.constant 3 : index
    %341 = memref.load %arg1[%c4_115, %c3_116] : memref<8x8xi32, #tpu.memory_space<smem>>
    %342 = vector.broadcast %341 : i32 to vector<1x64xi32>
    %343 = arith.cmpi eq, %0, %342 : vector<1x64xi32>
    %c0_i32_117 = arith.constant 0 : i32
    %344 = arith.cmpi ne, %341, %c0_i32_117 : i32
    %345 = vector.broadcast %344 : i1 to vector<1x64xi1>
    %346 = arith.andi %343, %345 : vector<1x64xi1>
    %347 = arith.extui %346 : vector<1x64xi1> to vector<1x64xi32>
    %348 = arith.sitofp %347 : vector<1x64xi32> to vector<1x64xf32>
    %349 = arith.addf %340, %348 : vector<1x64xf32>
    %c4_118 = arith.constant 4 : index
    %c4_119 = arith.constant 4 : index
    %350 = memref.load %arg1[%c4_118, %c4_119] : memref<8x8xi32, #tpu.memory_space<smem>>
    %351 = vector.broadcast %350 : i32 to vector<1x64xi32>
    %352 = arith.cmpi eq, %0, %351 : vector<1x64xi32>
    %c0_i32_120 = arith.constant 0 : i32
    %353 = arith.cmpi ne, %350, %c0_i32_120 : i32
    %354 = vector.broadcast %353 : i1 to vector<1x64xi1>
    %355 = arith.andi %352, %354 : vector<1x64xi1>
    %356 = arith.extui %355 : vector<1x64xi1> to vector<1x64xi32>
    %357 = arith.sitofp %356 : vector<1x64xi32> to vector<1x64xf32>
    %358 = arith.addf %349, %357 : vector<1x64xf32>
    %c4_121 = arith.constant 4 : index
    %c5_122 = arith.constant 5 : index
    %359 = memref.load %arg1[%c4_121, %c5_122] : memref<8x8xi32, #tpu.memory_space<smem>>
    %360 = vector.broadcast %359 : i32 to vector<1x64xi32>
    %361 = arith.cmpi eq, %0, %360 : vector<1x64xi32>
    %c0_i32_123 = arith.constant 0 : i32
    %362 = arith.cmpi ne, %359, %c0_i32_123 : i32
    %363 = vector.broadcast %362 : i1 to vector<1x64xi1>
    %364 = arith.andi %361, %363 : vector<1x64xi1>
    %365 = arith.extui %364 : vector<1x64xi1> to vector<1x64xi32>
    %366 = arith.sitofp %365 : vector<1x64xi32> to vector<1x64xf32>
    %367 = arith.addf %358, %366 : vector<1x64xf32>
    %c4_124 = arith.constant 4 : index
    %c6_125 = arith.constant 6 : index
    %368 = memref.load %arg1[%c4_124, %c6_125] : memref<8x8xi32, #tpu.memory_space<smem>>
    %369 = vector.broadcast %368 : i32 to vector<1x64xi32>
    %370 = arith.cmpi eq, %0, %369 : vector<1x64xi32>
    %c0_i32_126 = arith.constant 0 : i32
    %371 = arith.cmpi ne, %368, %c0_i32_126 : i32
    %372 = vector.broadcast %371 : i1 to vector<1x64xi1>
    %373 = arith.andi %370, %372 : vector<1x64xi1>
    %374 = arith.extui %373 : vector<1x64xi1> to vector<1x64xi32>
    %375 = arith.sitofp %374 : vector<1x64xi32> to vector<1x64xf32>
    %376 = arith.addf %367, %375 : vector<1x64xf32>
    %c4_127 = arith.constant 4 : index
    %c7_128 = arith.constant 7 : index
    %377 = memref.load %arg1[%c4_127, %c7_128] : memref<8x8xi32, #tpu.memory_space<smem>>
    %378 = vector.broadcast %377 : i32 to vector<1x64xi32>
    %379 = arith.cmpi eq, %0, %378 : vector<1x64xi32>
    %c0_i32_129 = arith.constant 0 : i32
    %380 = arith.cmpi ne, %377, %c0_i32_129 : i32
    %381 = vector.broadcast %380 : i1 to vector<1x64xi1>
    %382 = arith.andi %379, %381 : vector<1x64xi1>
    %383 = arith.extui %382 : vector<1x64xi1> to vector<1x64xi32>
    %384 = arith.sitofp %383 : vector<1x64xi32> to vector<1x64xf32>
    %385 = arith.addf %376, %384 : vector<1x64xf32>
    %c5_130 = arith.constant 5 : index
    %c0_131 = arith.constant 0 : index
    %386 = memref.load %arg2[%c5_130, %c0_131] : memref<8x1xi32, #tpu.memory_space<smem>>
    %387 = arith.sitofp %386 : i32 to f32
    %cst_132 = arith.constant 1.000000e+00 : f32
    %388 = arith.divf %cst_132, %387 : f32
    %389 = vector.broadcast %388 : f32 to vector<1x1xf32>
    %cst_133 = arith.constant 0.000000e+00 : f32
    %390 = vector.broadcast %cst_133 : f32 to vector<1x64xf32>
    %c5_134 = arith.constant 5 : index
    %c0_135 = arith.constant 0 : index
    %391 = memref.load %arg1[%c5_134, %c0_135] : memref<8x8xi32, #tpu.memory_space<smem>>
    %392 = vector.broadcast %391 : i32 to vector<1x64xi32>
    %393 = arith.cmpi eq, %0, %392 : vector<1x64xi32>
    %c0_i32_136 = arith.constant 0 : i32
    %394 = arith.cmpi ne, %391, %c0_i32_136 : i32
    %395 = vector.broadcast %394 : i1 to vector<1x64xi1>
    %396 = arith.andi %393, %395 : vector<1x64xi1>
    %397 = arith.extui %396 : vector<1x64xi1> to vector<1x64xi32>
    %398 = arith.sitofp %397 : vector<1x64xi32> to vector<1x64xf32>
    %399 = arith.addf %390, %398 : vector<1x64xf32>
    %c5_137 = arith.constant 5 : index
    %c1_138 = arith.constant 1 : index
    %400 = memref.load %arg1[%c5_137, %c1_138] : memref<8x8xi32, #tpu.memory_space<smem>>
    %401 = vector.broadcast %400 : i32 to vector<1x64xi32>
    %402 = arith.cmpi eq, %0, %401 : vector<1x64xi32>
    %c0_i32_139 = arith.constant 0 : i32
    %403 = arith.cmpi ne, %400, %c0_i32_139 : i32
    %404 = vector.broadcast %403 : i1 to vector<1x64xi1>
    %405 = arith.andi %402, %404 : vector<1x64xi1>
    %406 = arith.extui %405 : vector<1x64xi1> to vector<1x64xi32>
    %407 = arith.sitofp %406 : vector<1x64xi32> to vector<1x64xf32>
    %408 = arith.addf %399, %407 : vector<1x64xf32>
    %c5_140 = arith.constant 5 : index
    %c2_141 = arith.constant 2 : index
    %409 = memref.load %arg1[%c5_140, %c2_141] : memref<8x8xi32, #tpu.memory_space<smem>>
    %410 = vector.broadcast %409 : i32 to vector<1x64xi32>
    %411 = arith.cmpi eq, %0, %410 : vector<1x64xi32>
    %c0_i32_142 = arith.constant 0 : i32
    %412 = arith.cmpi ne, %409, %c0_i32_142 : i32
    %413 = vector.broadcast %412 : i1 to vector<1x64xi1>
    %414 = arith.andi %411, %413 : vector<1x64xi1>
    %415 = arith.extui %414 : vector<1x64xi1> to vector<1x64xi32>
    %416 = arith.sitofp %415 : vector<1x64xi32> to vector<1x64xf32>
    %417 = arith.addf %408, %416 : vector<1x64xf32>
    %c5_143 = arith.constant 5 : index
    %c3_144 = arith.constant 3 : index
    %418 = memref.load %arg1[%c5_143, %c3_144] : memref<8x8xi32, #tpu.memory_space<smem>>
    %419 = vector.broadcast %418 : i32 to vector<1x64xi32>
    %420 = arith.cmpi eq, %0, %419 : vector<1x64xi32>
    %c0_i32_145 = arith.constant 0 : i32
    %421 = arith.cmpi ne, %418, %c0_i32_145 : i32
    %422 = vector.broadcast %421 : i1 to vector<1x64xi1>
    %423 = arith.andi %420, %422 : vector<1x64xi1>
    %424 = arith.extui %423 : vector<1x64xi1> to vector<1x64xi32>
    %425 = arith.sitofp %424 : vector<1x64xi32> to vector<1x64xf32>
    %426 = arith.addf %417, %425 : vector<1x64xf32>
    %c5_146 = arith.constant 5 : index
    %c4_147 = arith.constant 4 : index
    %427 = memref.load %arg1[%c5_146, %c4_147] : memref<8x8xi32, #tpu.memory_space<smem>>
    %428 = vector.broadcast %427 : i32 to vector<1x64xi32>
    %429 = arith.cmpi eq, %0, %428 : vector<1x64xi32>
    %c0_i32_148 = arith.constant 0 : i32
    %430 = arith.cmpi ne, %427, %c0_i32_148 : i32
    %431 = vector.broadcast %430 : i1 to vector<1x64xi1>
    %432 = arith.andi %429, %431 : vector<1x64xi1>
    %433 = arith.extui %432 : vector<1x64xi1> to vector<1x64xi32>
    %434 = arith.sitofp %433 : vector<1x64xi32> to vector<1x64xf32>
    %435 = arith.addf %426, %434 : vector<1x64xf32>
    %c5_149 = arith.constant 5 : index
    %c5_150 = arith.constant 5 : index
    %436 = memref.load %arg1[%c5_149, %c5_150] : memref<8x8xi32, #tpu.memory_space<smem>>
    %437 = vector.broadcast %436 : i32 to vector<1x64xi32>
    %438 = arith.cmpi eq, %0, %437 : vector<1x64xi32>
    %c0_i32_151 = arith.constant 0 : i32
    %439 = arith.cmpi ne, %436, %c0_i32_151 : i32
    %440 = vector.broadcast %439 : i1 to vector<1x64xi1>
    %441 = arith.andi %438, %440 : vector<1x64xi1>
    %442 = arith.extui %441 : vector<1x64xi1> to vector<1x64xi32>
    %443 = arith.sitofp %442 : vector<1x64xi32> to vector<1x64xf32>
    %444 = arith.addf %435, %443 : vector<1x64xf32>
    %c5_152 = arith.constant 5 : index
    %c6_153 = arith.constant 6 : index
    %445 = memref.load %arg1[%c5_152, %c6_153] : memref<8x8xi32, #tpu.memory_space<smem>>
    %446 = vector.broadcast %445 : i32 to vector<1x64xi32>
    %447 = arith.cmpi eq, %0, %446 : vector<1x64xi32>
    %c0_i32_154 = arith.constant 0 : i32
    %448 = arith.cmpi ne, %445, %c0_i32_154 : i32
    %449 = vector.broadcast %448 : i1 to vector<1x64xi1>
    %450 = arith.andi %447, %449 : vector<1x64xi1>
    %451 = arith.extui %450 : vector<1x64xi1> to vector<1x64xi32>
    %452 = arith.sitofp %451 : vector<1x64xi32> to vector<1x64xf32>
    %453 = arith.addf %444, %452 : vector<1x64xf32>
    %c5_155 = arith.constant 5 : index
    %c7_156 = arith.constant 7 : index
    %454 = memref.load %arg1[%c5_155, %c7_156] : memref<8x8xi32, #tpu.memory_space<smem>>
    %455 = vector.broadcast %454 : i32 to vector<1x64xi32>
    %456 = arith.cmpi eq, %0, %455 : vector<1x64xi32>
    %c0_i32_157 = arith.constant 0 : i32
    %457 = arith.cmpi ne, %454, %c0_i32_157 : i32
    %458 = vector.broadcast %457 : i1 to vector<1x64xi1>
    %459 = arith.andi %456, %458 : vector<1x64xi1>
    %460 = arith.extui %459 : vector<1x64xi1> to vector<1x64xi32>
    %461 = arith.sitofp %460 : vector<1x64xi32> to vector<1x64xf32>
    %462 = arith.addf %453, %461 : vector<1x64xf32>
    %c6_158 = arith.constant 6 : index
    %c0_159 = arith.constant 0 : index
    %463 = memref.load %arg2[%c6_158, %c0_159] : memref<8x1xi32, #tpu.memory_space<smem>>
    %464 = arith.sitofp %463 : i32 to f32
    %cst_160 = arith.constant 1.000000e+00 : f32
    %465 = arith.divf %cst_160, %464 : f32
    %466 = vector.broadcast %465 : f32 to vector<1x1xf32>
    %cst_161 = arith.constant 0.000000e+00 : f32
    %467 = vector.broadcast %cst_161 : f32 to vector<1x64xf32>
    %c6_162 = arith.constant 6 : index
    %c0_163 = arith.constant 0 : index
    %468 = memref.load %arg1[%c6_162, %c0_163] : memref<8x8xi32, #tpu.memory_space<smem>>
    %469 = vector.broadcast %468 : i32 to vector<1x64xi32>
    %470 = arith.cmpi eq, %0, %469 : vector<1x64xi32>
    %c0_i32_164 = arith.constant 0 : i32
    %471 = arith.cmpi ne, %468, %c0_i32_164 : i32
    %472 = vector.broadcast %471 : i1 to vector<1x64xi1>
    %473 = arith.andi %470, %472 : vector<1x64xi1>
    %474 = arith.extui %473 : vector<1x64xi1> to vector<1x64xi32>
    %475 = arith.sitofp %474 : vector<1x64xi32> to vector<1x64xf32>
    %476 = arith.addf %467, %475 : vector<1x64xf32>
    %c6_165 = arith.constant 6 : index
    %c1_166 = arith.constant 1 : index
    %477 = memref.load %arg1[%c6_165, %c1_166] : memref<8x8xi32, #tpu.memory_space<smem>>
    %478 = vector.broadcast %477 : i32 to vector<1x64xi32>
    %479 = arith.cmpi eq, %0, %478 : vector<1x64xi32>
    %c0_i32_167 = arith.constant 0 : i32
    %480 = arith.cmpi ne, %477, %c0_i32_167 : i32
    %481 = vector.broadcast %480 : i1 to vector<1x64xi1>
    %482 = arith.andi %479, %481 : vector<1x64xi1>
    %483 = arith.extui %482 : vector<1x64xi1> to vector<1x64xi32>
    %484 = arith.sitofp %483 : vector<1x64xi32> to vector<1x64xf32>
    %485 = arith.addf %476, %484 : vector<1x64xf32>
    %c6_168 = arith.constant 6 : index
    %c2_169 = arith.constant 2 : index
    %486 = memref.load %arg1[%c6_168, %c2_169] : memref<8x8xi32, #tpu.memory_space<smem>>
    %487 = vector.broadcast %486 : i32 to vector<1x64xi32>
    %488 = arith.cmpi eq, %0, %487 : vector<1x64xi32>
    %c0_i32_170 = arith.constant 0 : i32
    %489 = arith.cmpi ne, %486, %c0_i32_170 : i32
    %490 = vector.broadcast %489 : i1 to vector<1x64xi1>
    %491 = arith.andi %488, %490 : vector<1x64xi1>
    %492 = arith.extui %491 : vector<1x64xi1> to vector<1x64xi32>
    %493 = arith.sitofp %492 : vector<1x64xi32> to vector<1x64xf32>
    %494 = arith.addf %485, %493 : vector<1x64xf32>
    %c6_171 = arith.constant 6 : index
    %c3_172 = arith.constant 3 : index
    %495 = memref.load %arg1[%c6_171, %c3_172] : memref<8x8xi32, #tpu.memory_space<smem>>
    %496 = vector.broadcast %495 : i32 to vector<1x64xi32>
    %497 = arith.cmpi eq, %0, %496 : vector<1x64xi32>
    %c0_i32_173 = arith.constant 0 : i32
    %498 = arith.cmpi ne, %495, %c0_i32_173 : i32
    %499 = vector.broadcast %498 : i1 to vector<1x64xi1>
    %500 = arith.andi %497, %499 : vector<1x64xi1>
    %501 = arith.extui %500 : vector<1x64xi1> to vector<1x64xi32>
    %502 = arith.sitofp %501 : vector<1x64xi32> to vector<1x64xf32>
    %503 = arith.addf %494, %502 : vector<1x64xf32>
    %c6_174 = arith.constant 6 : index
    %c4_175 = arith.constant 4 : index
    %504 = memref.load %arg1[%c6_174, %c4_175] : memref<8x8xi32, #tpu.memory_space<smem>>
    %505 = vector.broadcast %504 : i32 to vector<1x64xi32>
    %506 = arith.cmpi eq, %0, %505 : vector<1x64xi32>
    %c0_i32_176 = arith.constant 0 : i32
    %507 = arith.cmpi ne, %504, %c0_i32_176 : i32
    %508 = vector.broadcast %507 : i1 to vector<1x64xi1>
    %509 = arith.andi %506, %508 : vector<1x64xi1>
    %510 = arith.extui %509 : vector<1x64xi1> to vector<1x64xi32>
    %511 = arith.sitofp %510 : vector<1x64xi32> to vector<1x64xf32>
    %512 = arith.addf %503, %511 : vector<1x64xf32>
    %c6_177 = arith.constant 6 : index
    %c5_178 = arith.constant 5 : index
    %513 = memref.load %arg1[%c6_177, %c5_178] : memref<8x8xi32, #tpu.memory_space<smem>>
    %514 = vector.broadcast %513 : i32 to vector<1x64xi32>
    %515 = arith.cmpi eq, %0, %514 : vector<1x64xi32>
    %c0_i32_179 = arith.constant 0 : i32
    %516 = arith.cmpi ne, %513, %c0_i32_179 : i32
    %517 = vector.broadcast %516 : i1 to vector<1x64xi1>
    %518 = arith.andi %515, %517 : vector<1x64xi1>
    %519 = arith.extui %518 : vector<1x64xi1> to vector<1x64xi32>
    %520 = arith.sitofp %519 : vector<1x64xi32> to vector<1x64xf32>
    %521 = arith.addf %512, %520 : vector<1x64xf32>
    %c6_180 = arith.constant 6 : index
    %c6_181 = arith.constant 6 : index
    %522 = memref.load %arg1[%c6_180, %c6_181] : memref<8x8xi32, #tpu.memory_space<smem>>
    %523 = vector.broadcast %522 : i32 to vector<1x64xi32>
    %524 = arith.cmpi eq, %0, %523 : vector<1x64xi32>
    %c0_i32_182 = arith.constant 0 : i32
    %525 = arith.cmpi ne, %522, %c0_i32_182 : i32
    %526 = vector.broadcast %525 : i1 to vector<1x64xi1>
    %527 = arith.andi %524, %526 : vector<1x64xi1>
    %528 = arith.extui %527 : vector<1x64xi1> to vector<1x64xi32>
    %529 = arith.sitofp %528 : vector<1x64xi32> to vector<1x64xf32>
    %530 = arith.addf %521, %529 : vector<1x64xf32>
    %c6_183 = arith.constant 6 : index
    %c7_184 = arith.constant 7 : index
    %531 = memref.load %arg1[%c6_183, %c7_184] : memref<8x8xi32, #tpu.memory_space<smem>>
    %532 = vector.broadcast %531 : i32 to vector<1x64xi32>
    %533 = arith.cmpi eq, %0, %532 : vector<1x64xi32>
    %c0_i32_185 = arith.constant 0 : i32
    %534 = arith.cmpi ne, %531, %c0_i32_185 : i32
    %535 = vector.broadcast %534 : i1 to vector<1x64xi1>
    %536 = arith.andi %533, %535 : vector<1x64xi1>
    %537 = arith.extui %536 : vector<1x64xi1> to vector<1x64xi32>
    %538 = arith.sitofp %537 : vector<1x64xi32> to vector<1x64xf32>
    %539 = arith.addf %530, %538 : vector<1x64xf32>
    %c7_186 = arith.constant 7 : index
    %c0_187 = arith.constant 0 : index
    %540 = memref.load %arg2[%c7_186, %c0_187] : memref<8x1xi32, #tpu.memory_space<smem>>
    %541 = arith.sitofp %540 : i32 to f32
    %cst_188 = arith.constant 1.000000e+00 : f32
    %542 = arith.divf %cst_188, %541 : f32
    %543 = vector.broadcast %542 : f32 to vector<1x1xf32>
    %cst_189 = arith.constant 0.000000e+00 : f32
    %544 = vector.broadcast %cst_189 : f32 to vector<1x64xf32>
    %c7_190 = arith.constant 7 : index
    %c0_191 = arith.constant 0 : index
    %545 = memref.load %arg1[%c7_190, %c0_191] : memref<8x8xi32, #tpu.memory_space<smem>>
    %546 = vector.broadcast %545 : i32 to vector<1x64xi32>
    %547 = arith.cmpi eq, %0, %546 : vector<1x64xi32>
    %c0_i32_192 = arith.constant 0 : i32
    %548 = arith.cmpi ne, %545, %c0_i32_192 : i32
    %549 = vector.broadcast %548 : i1 to vector<1x64xi1>
    %550 = arith.andi %547, %549 : vector<1x64xi1>
    %551 = arith.extui %550 : vector<1x64xi1> to vector<1x64xi32>
    %552 = arith.sitofp %551 : vector<1x64xi32> to vector<1x64xf32>
    %553 = arith.addf %544, %552 : vector<1x64xf32>
    %c7_193 = arith.constant 7 : index
    %c1_194 = arith.constant 1 : index
    %554 = memref.load %arg1[%c7_193, %c1_194] : memref<8x8xi32, #tpu.memory_space<smem>>
    %555 = vector.broadcast %554 : i32 to vector<1x64xi32>
    %556 = arith.cmpi eq, %0, %555 : vector<1x64xi32>
    %c0_i32_195 = arith.constant 0 : i32
    %557 = arith.cmpi ne, %554, %c0_i32_195 : i32
    %558 = vector.broadcast %557 : i1 to vector<1x64xi1>
    %559 = arith.andi %556, %558 : vector<1x64xi1>
    %560 = arith.extui %559 : vector<1x64xi1> to vector<1x64xi32>
    %561 = arith.sitofp %560 : vector<1x64xi32> to vector<1x64xf32>
    %562 = arith.addf %553, %561 : vector<1x64xf32>
    %c7_196 = arith.constant 7 : index
    %c2_197 = arith.constant 2 : index
    %563 = memref.load %arg1[%c7_196, %c2_197] : memref<8x8xi32, #tpu.memory_space<smem>>
    %564 = vector.broadcast %563 : i32 to vector<1x64xi32>
    %565 = arith.cmpi eq, %0, %564 : vector<1x64xi32>
    %c0_i32_198 = arith.constant 0 : i32
    %566 = arith.cmpi ne, %563, %c0_i32_198 : i32
    %567 = vector.broadcast %566 : i1 to vector<1x64xi1>
    %568 = arith.andi %565, %567 : vector<1x64xi1>
    %569 = arith.extui %568 : vector<1x64xi1> to vector<1x64xi32>
    %570 = arith.sitofp %569 : vector<1x64xi32> to vector<1x64xf32>
    %571 = arith.addf %562, %570 : vector<1x64xf32>
    %c7_199 = arith.constant 7 : index
    %c3_200 = arith.constant 3 : index
    %572 = memref.load %arg1[%c7_199, %c3_200] : memref<8x8xi32, #tpu.memory_space<smem>>
    %573 = vector.broadcast %572 : i32 to vector<1x64xi32>
    %574 = arith.cmpi eq, %0, %573 : vector<1x64xi32>
    %c0_i32_201 = arith.constant 0 : i32
    %575 = arith.cmpi ne, %572, %c0_i32_201 : i32
    %576 = vector.broadcast %575 : i1 to vector<1x64xi1>
    %577 = arith.andi %574, %576 : vector<1x64xi1>
    %578 = arith.extui %577 : vector<1x64xi1> to vector<1x64xi32>
    %579 = arith.sitofp %578 : vector<1x64xi32> to vector<1x64xf32>
    %580 = arith.addf %571, %579 : vector<1x64xf32>
    %c7_202 = arith.constant 7 : index
    %c4_203 = arith.constant 4 : index
    %581 = memref.load %arg1[%c7_202, %c4_203] : memref<8x8xi32, #tpu.memory_space<smem>>
    %582 = vector.broadcast %581 : i32 to vector<1x64xi32>
    %583 = arith.cmpi eq, %0, %582 : vector<1x64xi32>
    %c0_i32_204 = arith.constant 0 : i32
    %584 = arith.cmpi ne, %581, %c0_i32_204 : i32
    %585 = vector.broadcast %584 : i1 to vector<1x64xi1>
    %586 = arith.andi %583, %585 : vector<1x64xi1>
    %587 = arith.extui %586 : vector<1x64xi1> to vector<1x64xi32>
    %588 = arith.sitofp %587 : vector<1x64xi32> to vector<1x64xf32>
    %589 = arith.addf %580, %588 : vector<1x64xf32>
    %c7_205 = arith.constant 7 : index
    %c5_206 = arith.constant 5 : index
    %590 = memref.load %arg1[%c7_205, %c5_206] : memref<8x8xi32, #tpu.memory_space<smem>>
    %591 = vector.broadcast %590 : i32 to vector<1x64xi32>
    %592 = arith.cmpi eq, %0, %591 : vector<1x64xi32>
    %c0_i32_207 = arith.constant 0 : i32
    %593 = arith.cmpi ne, %590, %c0_i32_207 : i32
    %594 = vector.broadcast %593 : i1 to vector<1x64xi1>
    %595 = arith.andi %592, %594 : vector<1x64xi1>
    %596 = arith.extui %595 : vector<1x64xi1> to vector<1x64xi32>
    %597 = arith.sitofp %596 : vector<1x64xi32> to vector<1x64xf32>
    %598 = arith.addf %589, %597 : vector<1x64xf32>
    %c7_208 = arith.constant 7 : index
    %c6_209 = arith.constant 6 : index
    %599 = memref.load %arg1[%c7_208, %c6_209] : memref<8x8xi32, #tpu.memory_space<smem>>
    %600 = vector.broadcast %599 : i32 to vector<1x64xi32>
    %601 = arith.cmpi eq, %0, %600 : vector<1x64xi32>
    %c0_i32_210 = arith.constant 0 : i32
    %602 = arith.cmpi ne, %599, %c0_i32_210 : i32
    %603 = vector.broadcast %602 : i1 to vector<1x64xi1>
    %604 = arith.andi %601, %603 : vector<1x64xi1>
    %605 = arith.extui %604 : vector<1x64xi1> to vector<1x64xi32>
    %606 = arith.sitofp %605 : vector<1x64xi32> to vector<1x64xf32>
    %607 = arith.addf %598, %606 : vector<1x64xf32>
    %c7_211 = arith.constant 7 : index
    %c7_212 = arith.constant 7 : index
    %608 = memref.load %arg1[%c7_211, %c7_212] : memref<8x8xi32, #tpu.memory_space<smem>>
    %609 = vector.broadcast %608 : i32 to vector<1x64xi32>
    %610 = arith.cmpi eq, %0, %609 : vector<1x64xi32>
    %c0_i32_213 = arith.constant 0 : i32
    %611 = arith.cmpi ne, %608, %c0_i32_213 : i32
    %612 = vector.broadcast %611 : i1 to vector<1x64xi1>
    %613 = arith.andi %610, %612 : vector<1x64xi1>
    %614 = arith.extui %613 : vector<1x64xi1> to vector<1x64xi32>
    %615 = arith.sitofp %614 : vector<1x64xi32> to vector<1x64xf32>
    %616 = arith.addf %607, %615 : vector<1x64xf32>
    %617 = tpu.concatenate %77, %154, %231, %308, %385, %462, %539, %616 in 0 : vector<1x64xf32>, vector<1x64xf32>, vector<1x64xf32>, vector<1x64xf32>, vector<1x64xf32>, vector<1x64xf32>, vector<1x64xf32>, vector<1x64xf32> -> vector<8x64xf32>
    %618 = tpu.concatenate %4, %81, %158, %235, %312, %389, %466, %543 in 0 : vector<1x1xf32>, vector<1x1xf32>, vector<1x1xf32>, vector<1x1xf32>, vector<1x1xf32>, vector<1x1xf32>, vector<1x1xf32>, vector<1x1xf32> -> vector<8x1xf32>
    %619 = arith.truncf %617 : vector<8x64xf32> to vector<8x64xbf16>
    %c0_214 = arith.constant 0 : index
    %c0_215 = arith.constant 0 : index
    %620 = vector.load %arg3[%c0_214, %c0_215] : memref<64x128xbf16, #tpu.memory_space<vmem>>, vector<64x128xbf16>
    %cst_216 = arith.constant dense<0.000000e+00> : vector<8x128xf32>
    %621 = tpu.matmul %619, %620, %cst_216 {dimension_numbers = #tpu.dot_dimension_numbers<[1], [0], [0], [1], [0, 0, 1, 1], [], []>} : vector<8x64xbf16>, vector<64x128xbf16>, vector<8x128xf32> -> vector<8x128xf32>
    %622 = vector.broadcast %618 : vector<8x1xf32> to vector<8x128xf32>
    %623 = arith.mulf %621, %622 : vector<8x128xf32>
    %c0_217 = arith.constant 0 : index
    %c0_218 = arith.constant 0 : index
    %624 = vector.load %arg4[%c0_217, %c0_218] : memref<1x128xf32, #tpu.memory_space<vmem>>, vector<1x128xf32>
    %625 = vector.broadcast %624 : vector<1x128xf32> to vector<8x128xf32>
    %626 = arith.addf %623, %625 : vector<8x128xf32>
    %c0_219 = arith.constant 0 : index
    %c0_220 = arith.constant 0 : index
    %627 = vector.load %arg5[%c0_219, %c0_220] : memref<8x128xf32, #tpu.memory_space<vmem>>, vector<8x128xf32>
    tpu.vector_store %arg5[%c0_219, %c0_220], %626 {strides = array<i32>} : memref<8x128xf32, #tpu.memory_space<vmem>>, vector<8x128xf32>,
    return
  }
  func.func @transform_0(%arg0: i32) -> (i32, i32) {
    %c0_i32 = arith.constant 0 : i32
    %c0_i32_0 = arith.constant 0 : i32
    %c0_i32_1 = arith.constant 0 : i32
    return %c0_i32, %c0_i32_0 : i32, i32
  }
  func.func @transform_1(%arg0: i32) -> (i32, i32) {
    %c0_i32 = arith.constant 0 : i32
    %c0_i32_0 = arith.constant 0 : i32
    %c0_i32_1 = arith.constant 0 : i32
    return %c0_i32, %c0_i32_0 : i32, i32
  }
  func.func @transform_2(%arg0: i32) -> (i32, i32) {
    %c0_i32 = arith.constant 0 : i32
    %c0_i32_0 = arith.constant 0 : i32
    %c0_i32_1 = arith.constant 0 : i32
    return %c0_i32, %c0_i32_0 : i32, i32
  }
  func.func @transform_3(%arg0: i32) -> (i32, i32) {
    %c0_i32 = arith.constant 0 : i32
    %c0_i32_0 = arith.constant 0 : i32
    %c0_i32_1 = arith.constant 0 : i32
    return %c0_i32, %c0_i32_0 : i32, i32
  }
  func.func @transform_4(%arg0: i32) -> (i32, i32) {
    %c0_i32 = arith.constant 0 : i32
    %c0_i32_0 = arith.constant 0 : i32
    %c0_i32_1 = arith.constant 0 : i32
    return %c0_i32, %c0_i32_0 : i32, i32
  }
}

</mosaic_0001>

<bundles_post_ra>
// kernel: bag_of_ngrams_fused.1
= control target key start
LH: loop header
LB: loop body
LE: loop exit
PB: predicated region body
PF: predicated region fallthrough
CT: control target
= control target key end

     0   :  { %s2821_s0 = inlined_call_operand.vmem [shape: s32[8,8], index: 0, kind: input, shape index: {}]   ;;  %s2822_s1 = inlined_call_operand.vmem [shape: s32[8,1], index: 1, kind: input, shape index: {}]   ;;  %s2823_s2 = inlined_call_operand.vmem [shape: bf16[64,128], index: 2, kind: input, shape index: {}]   ;;  %s2824_s3 = inlined_call_operand.vmem [shape: f32[1,128], index: 3, kind: input, shape index: {}]   ;;  %s2825_s4 = inlined_call_operand.vmem [shape: f32[8,128], index: 4, kind: output, shape index: {}]  }
   0x1   :  { %2835 = sst [smem:[#allocation15_spill]] %s2824_s3 }
   0x2   :  { %2836 = sst [smem:[#allocation16_spill]] %s2825_s4 }
   0x3   :  { %9 = vsyncpa [#allocation3], 0  ;;  %s17_s17 = sshll.u32 %s2821_s0, 4  ;;  %s18_s17 = int_to_ptr.vmem [resolvable:$true] %s17_s17 }
   0x4   :  { %10 = vsyncpa [#allocation5], 0  ;;  %s27_s20 = sshll.u32 %s2822_s1, 4  ;;  %s1115_s21 = scalar_lea.vmem %s18_s17, 128  ;;  %s28_s20 = int_to_ptr.vmem [resolvable:$true] %s27_s20 }
   0x5   :  { %p1116_p0 = scmp.ne.s32.totalorder %s18_s17, %s1115_s21  ;;  %p1120_p1 = scmp.lt.s32.totalorder %s18_s17, %s18_s17 }
   0x6   :  { %p1121_p2 = scmp.lt.s32.totalorder %s1115_s21, %s1115_s21 }
   0x8   :  { %p1122_p3 = por %p1121_p2, %p1120_p1 }
   0xa   :  { %p1123_p4 = pnand %p1122_p3, %p1116_p0 }
   0xc   :  { %1126 = shalt.err (!%p1123_p4)
}
   0xd   :  { %s1143_s22 = smov [#allocation2]   ;;  %s1127_s23 = scalar_lea.vmem %s28_s20, 128 }
   0xe   :  { %20 = dma.vmem_to_smem %s18_s17, 128, %s1143_s22, [#allocation3]  }
   0xf   :  { %p1128_p5 = scmp.ne.s32.totalorder %s28_s20, %s1127_s23  ;;  %p1132_p6 = scmp.lt.s32.totalorder %s28_s20, %s28_s20 }
  0x10   :  { %p1133_p7 = scmp.lt.s32.totalorder %s1127_s23, %s1127_s23 }
  0x12   :  { %p1134_p8 = por %p1133_p7, %p1132_p6 }
  0x14   :  { %p1135_p9 = pnand %p1134_p8, %p1128_p5 }
  0x16   :  { %1138 = shalt.err (!%p1135_p9)
}
  0x17   :  { %s1144_s0 = smov [#allocation4]  }
  0x18   :  { %30 = dma.vmem_to_smem %s28_s20, 128, %s1144_s0, [#allocation5]  }
  0x19   :  { %1139 = dma.done.wait [#allocation3], 128  }
  0x1a   :  { %1140 = vsyncadd [#allocation3], 4294967168 }
  0x1b   :  { %1141 = dma.done.wait [#allocation5], 128  }
  0x1c   :  { %1142 = vsyncadd [#allocation5], 4294967168 }
  0x1d   :  { %41 = sfence }
  0x1e   :  { %v1095_v0 = vld [vmem:[%s2823_s2] sm:$0xff]   ;;  %v1145_v1 = vmov 0.0   ;;  %v1096_v2 = vld [vmem:[%s2823_s2 + $0x8] sm:$0xff]   ;;  %vm1146_vm0 = vmmov 0   ;;  %s1188_s27 = sld [smem:[#allocation2]]  ;;  %s1190_s28 = sld [smem:[#allocation2 + $0x1]]  ;;  %v43_v5 = vlaneseq }
  0x1f   :  { %1061 = vmatprep.subr.bf16.mxu0 %v1145_v1  ;;  %1069 = vmatprep.mubr.msk.bf16.mxu0 %vm1146_vm0, %v1145_v1  ;;  %s1192_s29 = sld [smem:[#allocation2 + $0x2]]  ;;  %s1194_s30 = sld [smem:[#allocation2 + $0x3]]  ;;  %v1097_v3 = vld [vmem:[%s2823_s2 + $0x10] sm:$0xff]   ;;  %v1098_v4 = vld [vmem:[%s2823_s2 + $0x18] sm:$0xff]   ;;  %v2916_v32 = vmov 0 }
  0x20   :  { %1062 = vmatpush3.bf16.msra.mxu0 %v1095_v0  ;;  %s1199_s7 = sld [smem:[#allocation2 + $0x4]]  ;;  %s1201_s8 = sld [smem:[#allocation2 + $0x5]]  ;;  %v1276_v6 = vand.u32 127, %v43_v5 }
  0x21   :  { %1063 = vmatprep.subr.bf16.mxu0 %v1145_v1  ;;  %s1204_s9 = sld [smem:[#allocation2 + $0x6]]  ;;  %s1206_s10 = sld [smem:[#allocation2 + $0x7]] }
  0x22   :  { %s1208_s11 = sld [smem:[#allocation2 + $0x80]]  ;;  %s1210_s12 = sld [smem:[#allocation2 + $0x81]] }
  0x23   :  { %s1212_s13 = sld [smem:[#allocation2 + $0x82]]  ;;  %s1214_s14 = sld [smem:[#allocation2 + $0x83]] }
  0x24   :  { %1064 = vmatpush3.bf16.msra.mxu0 %v1096_v2  ;;  %p54_p10 = scmp.ne.s32.totalorder %s1188_s27, 0  ;;  %p65_p11 = scmp.ne.s32.totalorder %s1190_s28, 0  ;;  %v52_v7 = vstv %s1188_s27  ;;  %v63_v9 = vstv %s1190_s28 }
  0x25   :  { %1065 = vmatprep.subr.bf16.mxu0 %v1145_v1  ;;  %p76_p12 = scmp.ne.s32.totalorder %s1192_s29, 0  ;;  %p87_p13 = scmp.ne.s32.totalorder %s1194_s30, 0  ;;  %vm1293_vm1 = vcmp.eq.s32.totalorder %v1276_v6, %v52_v7  ;;  %vm1304_vm3 = vcmp.eq.s32.totalorder %v1276_v6, %v63_v9  ;;  %v74_v15 = vstv %s1192_s29  ;;  %v85_v19 = vstv %s1194_s30 }
  0x26   :  { %s1224_s17 = scalar_select %p54_p10, 1, 0  ;;  %vm1331_vm7 = vcmp.eq.s32.totalorder %v1276_v6, %v74_v15  ;;  %vm1360_vm10 = vcmp.eq.s32.totalorder %v1276_v6, %v85_v19  ;;  %v96_v29 = vstv %s1199_s7  ;;  %v107_v42 = vstv %s1201_s8 }
  0x27   :  { %2837 = sst [smem:[#allocation8_spill]] %s1204_s9  ;;  %p98_p0 = scmp.ne.s32.totalorder %s1199_s7, 0 }
  0x28   :  { %2838 = sst [smem:[#allocation9_spill]] %s1206_s10  ;;  %1066 = vmatpush3.bf16.msra.mxu0 %v1097_v3  ;;  %p109_p1 = scmp.ne.s32.totalorder %s1201_s8, 0  ;;  %v56_v8 = vstv %s1224_s17  ;;  %v146_v21 = vstv %s1208_s11  ;;  %v157_v25 = vstv %s1210_s12 }
  0x29   :  { %2839 = sst [smem:[#allocation10_spill]] %s1214_s14  ;;  %1067 = vmatprep.subr.bf16.mxu0 %v1145_v1  ;;  %p120_p2 = scmp.ne.s32.totalorder %s1204_s9, 0  ;;  %vm1297_vm2 = vcmp.eq.s32.totalorder %v56_v8, 1  ;;  %vm1375_vm12 = vcmp.eq.s32.totalorder %v1276_v6, %v146_v21  ;;  %vm1386_vm14 = vcmp.eq.s32.totalorder %v1276_v6, %v157_v25  ;;  %v168_v37 = vstv %s1212_s13 }
  0x2a   :  { %s1226_s18 = scalar_select %p65_p11, 1, 0  ;;  %vm58_vm5 = vmand %vm1293_vm1, %vm1297_vm2  ;;  %vm1406_vm1 = vcmp.eq.s32.totalorder %v1276_v6, %v96_v29  ;;  %v1147_v29 = vmov 0  }
  0x2b   :  { %s1228_s19 = scalar_select %p76_p12, 1, 0  ;;  %v916_v23 = vsel %vm58_vm5, 1.0, %v1145_v1  ;;  %vm1434_vm5 = vcmp.eq.s32.totalorder %v1276_v6, %v168_v37  ;;  %1094 = vset.pattern.permute.xlu0 %v1147_v29 }
  0x2c   :  { %1068 = vmatpush3.bf16.msra.mxu0 %v1098_v4  ;;  %s1230_s20 = scalar_select %p87_p13, 1, 0  ;;  %v67_v10 = vstv %s1226_s18 }
  0x2d   :  { %p131_p3 = scmp.ne.s32.totalorder %s1206_s10, 0  ;;  %p148_p4 = scmp.ne.s32.totalorder %s1208_s11, 0  ;;  %vm1308_vm4 = vcmp.eq.s32.totalorder %v67_v10, 1  ;;  %v78_v16 = vstv %s1228_s19 }
  0x2e   :  { %s1236_s2 = scalar_select %p98_p0, 1, 0  ;;  %vm69_vm6 = vmand %vm1304_vm3, %vm1308_vm4  ;;  %vm1335_vm8 = vcmp.eq.s32.totalorder %v78_v16, 1  ;;  %v89_v20 = vstv %s1230_s20 }
  0x2f   :  { %s1238_s21 = scalar_select %p109_p1, 1, 0  ;;  %v918_v24 = vsel %vm69_vm6, 1.0, %v1145_v1  ;;  %vm80_vm9 = vmand %vm1331_vm7, %vm1335_vm8  ;;  %vm1364_vm11 = vcmp.eq.s32.totalorder %v89_v20, 1 }
  0x30   :  { %s1240_s22 = scalar_select %p120_p2, 1, 0  ;;  %v100_v30 = vstv %s1236_s2  ;;  %v72_v33 = vadd.f32 %v918_v24, %v916_v23  ;;  %v920_v36 = vsel %vm80_vm9, 1.0, %v1145_v1  ;;  %vm91_vm0 = vmand %vm1360_vm10, %vm1364_vm11  ;;  %vm1466_vm9 = vcmp.eq.s32.totalorder %v1276_v6, %v107_v42 }
  0x31   :  { %s1242_s23 = scalar_select %p131_p3, 1, 0  ;;  %vm1410_vm2 = vcmp.eq.s32.totalorder %v100_v30, 1  ;;  %v111_v41 = vstv %s1238_s21  ;;  %v922_v47 = vsel %vm91_vm0, 1.0, %v1145_v1 }
  0x32   :  { %2840 = sst [smem:[#allocation11_spill]] %s1240_s22  ;;  %p159_p5 = scmp.ne.s32.totalorder %s1210_s12, 0  ;;  %v83_v43 = vadd.f32 %v920_v36, %v72_v33  ;;  %vm102_vm7 = vmand %vm1406_vm1, %vm1410_vm2  ;;  %vm1456_vm8 = vcmp.eq.s32.totalorder %v111_v41, 1 }
  0x33   :  { %2841 = sst [smem:[#allocation12_spill]] %s1242_s23  ;;  %p170_p6 = scmp.ne.s32.totalorder %s1212_s13, 0  ;;  %v924_v58 = vsel %vm102_vm7, 1.0, %v1145_v1 }
  0x34   :  { %p181_p7 = scmp.ne.s32.totalorder %s1214_s14, 0  ;;  %s1256_s26 = sld [smem:[#allocation2 + $0x84]]  ;;  %v94_v57 = vadd.f32 %v922_v47, %v83_v43 }
  0x35   :  { %s1248_s0 = scalar_select %p148_p4, 1, 0 }
  0x36   :  { %s1250_s1 = scalar_select %p159_p5, 1, 0  ;;  %v105_v14 = vadd.f32 %v924_v58, %v94_v57 }
  0x37   :  { %s1252_s24 = scalar_select %p170_p6, 1, 0  ;;  %v150_v22 = vstv %s1248_s0 }
  0x38   :  { %s1254_s25 = scalar_select %p181_p7, 1, 0  ;;  %v161_v26 = vstv %s1250_s1  ;;  %vm1379_vm13 = vcmp.eq.s32.totalorder %v150_v22, 1 }
  0x39   :  { %s1258_s5 = sld [smem:[#allocation2 + $0x85]]  ;;  %s1260_s6 = sld [smem:[#allocation2 + $0x86]]  ;;  %vm1390_vm15 = vcmp.eq.s32.totalorder %v161_v26, 1  ;;  %v172_v38 = vstv %s1252_s24  ;;  %vm152_vm3 = vmand %vm1375_vm12, %vm1379_vm13 }
  0x3a   :  { %2842 = sst [smem:[#allocation13_spill]] %s1254_s25  ;;  %s1262_s15 = sld [smem:[#allocation2 + $0x87]]  ;;  %vm163_vm4 = vmand %vm1386_vm14, %vm1390_vm15  ;;  %vm1438_vm6 = vcmp.eq.s32.totalorder %v172_v38, 1  ;;  %v933_v51 = vsel %vm152_vm3, 1.0, %v1145_v1  ;;  %v190_v63 = vstv %s1256_s26 }
  0x3b   :  { %s1264_s16 = sld [smem:[#allocation2 + $0x100]]  ;;  %s1266_s4 = sld [smem:[#allocation2 + $0x101]]  ;;  %v935_v52 = vsel %vm163_vm4, 1.0, %v1145_v1  ;;  %vm174_vm11 = vmand %vm1434_vm5, %vm1438_vm6  ;;  %vm1567_vm3 = vcmp.eq.s32.totalorder %v1276_v6, %v190_v63 }
  0x3c   :  { %s1268_s3 = sld [smem:[#allocation2 + $0x102]]  ;;  %s1270_s23 = sld [smem:[#allocation2 + $0x103]]  ;;  %vm113_vm13 = vmand %vm1466_vm9, %vm1456_vm8  ;;  %v166_v61 = vadd.f32 %v935_v52, %v933_v51  ;;  %v937_v3 = vsel %vm174_vm11, 1.0, %v1145_v1 }
  0x3d   :  { %s1272_s10 = sld [smem:[#allocation2 + $0x104]]  ;;  %s1274_s22 = sld [smem:[#allocation2 + $0x105]]  ;;  %v926_v10 = vsel %vm113_vm13, 1.0, %v1145_v1 }
  0x3e   :  { %s1278_s25 = sld [smem:[#allocation2 + $0x106]]  ;;  %s1280_s14 = sld [smem:[#allocation2 + $0x107]]  ;;  %v177_v15 = vadd.f32 %v937_v3, %v166_v61  ;;  %v116_v27 = vadd.f32 %v926_v10, %v105_v14 }
  0x3f   :  { %p192_p8 = scmp.ne.s32.totalorder %s1256_s26, 0  ;;  %p203_p9 = scmp.ne.s32.totalorder %s1258_s5, 0  ;;  %v201_v18 = vstv %s1258_s5  ;;  %v212_v23 = vstv %s1260_s6 }
  0x40   :  { %p214_p10 = scmp.ne.s32.totalorder %s1260_s6, 0  ;;  %p225_p11 = scmp.ne.s32.totalorder %s1262_s15, 0  ;;  %vm1641_vm13 = vcmp.eq.s32.totalorder %v1276_v6, %v201_v18  ;;  %v223_v35 = vstv %s1262_s15 }
  0x41   :  { %s1290_s9 = scalar_select %p192_p8, 1, 0  ;;  %v240_v4 = vstv %s1264_s16  ;;  %v251_v8 = vstv %s1266_s4 }
  0x42   :  { %s1301_s27 = scalar_select %p203_p9, 1, 0  ;;  %vm1582_vm6 = vcmp.eq.s32.totalorder %v1276_v6, %v240_v4  ;;  %vm1597_vm8 = vcmp.eq.s32.totalorder %v1276_v6, %v251_v8  ;;  %v262_v24 = vstv %s1268_s3  ;;  %v273_v36 = vstv %s1270_s23 }
  0x43   :  { %s1312_s28 = scalar_select %p214_p10, 1, 0  ;;  %v194_v0 = vstv %s1290_s9  ;;  %v284_v38 = vstv %s1272_s10  ;;  %v295_v58 = vstv %s1274_s22 }
  0x44   :  { %2843 = sst [smem:[#allocation14_spill]] %s1280_s14  ;;  %p242_p12 = scmp.ne.s32.totalorder %s1264_s16, 0  ;;  %vm1571_vm4 = vcmp.eq.s32.totalorder %v194_v0, 1  ;;  %v205_v19 = vstv %s1301_s27  ;;  %v306_v0 = vstv %s1278_s25 }
  0x45   :  { %s1316_s17 = scalar_select %p225_p11, 1, 0  ;;  %vm196_vm11 = vmand %vm1567_vm3, %vm1571_vm4  ;;  %v216_v30 = vstv %s1312_s28 }
  0x46   :  { %p253_p13 = scmp.ne.s32.totalorder %s1266_s4, 0  ;;  %p264_p0 = scmp.ne.s32.totalorder %s1268_s3, 0  ;;  %v941_v39 = vsel %vm196_vm11, 1.0, %v1145_v1  ;;  %vm1750_vm11 = vcmp.eq.s32.totalorder %v1276_v6, %v284_v38 }
  0x47   :  { %p275_p1 = scmp.ne.s32.totalorder %s1270_s23, 0  ;;  %p286_p2 = scmp.ne.s32.totalorder %s1272_s10, 0  ;;  %v227_v46 = vstv %s1316_s17 }
  0x48   :  { %s1341_s29 = scalar_select %p242_p12, 1, 0 }
  0x49   :  { %s1345_s18 = scalar_select %p253_p13, 1, 0 }
  0x4a   :  { %s1353_s30 = scalar_select %p264_p0, 1, 0  ;;  %v244_v5 = vstv %s1341_s29 }
  0x4b   :  { %s1370_s11 = scalar_select %p275_p1, 1, 0  ;;  %v255_v9 = vstv %s1345_s18  ;;  %vm1586_vm7 = vcmp.eq.s32.totalorder %v244_v5, 1 }
  0x4c   :  { %p297_p3 = scmp.ne.s32.totalorder %s1274_s22, 0  ;;  %p308_p4 = scmp.ne.s32.totalorder %s1278_s25, 0  ;;  %vm1601_vm9 = vcmp.eq.s32.totalorder %v255_v9, 1  ;;  %v266_v25 = vstv %s1353_s30 }
  0x4d   :  { %s2868_s7 = sld [smem:[#allocation8_spill]]  ;;  %p319_p5 = scmp.ne.s32.totalorder %s1280_s14, 0  ;;  %v277_v37 = vstv %s1370_s11  ;;  %vm2925_vm3 = vmand %vm1597_vm8, %vm1601_vm9 }
  0x4e   :  { %s1403_s12 = scalar_select %p286_p2, 1, 0  ;;  %v952_v42 = vsel %vm2925_vm3, 1.0, %v1145_v1 }
  0x4f   :  { %s2871_s19 = sld [smem:[#allocation10_spill]]  ;;  %s2874_s20 = sld [smem:[#allocation13_spill]] }
  0x50   :  { %s1421_s13 = scalar_select %p297_p3, 1, 0  ;;  %v288_v52 = vstv %s1403_s12 }
  0x51   :  { %s1430_s2 = scalar_select %p308_p4, 1, 0 }
  0x52   :  { %s2878_s21 = sld [smem:[#allocation11_spill]]  ;;  %s2881_s8 = sld [smem:[#allocation9_spill]]  ;;  %v299_v63 = vstv %s1421_s13 }
  0x53   :  { %2875 = sst [smem:[#allocation8_spill]] %s1430_s2  ;;  %v118_v44 = vstv %s2868_s7  ;;  %s2885_s24 = sld [smem:[#allocation12_spill]] }
  0x54   :  { %s1444_s0 = scalar_select %p319_p5, 1, 0  ;;  %vm1483_vm10 = vcmp.eq.s32.totalorder %v1276_v6, %v118_v44 }
  0x55   :  { %v179_v49 = vstv %s2871_s19  ;;  %s1461_s1 = sld [smem:[#allocation2 + $0x180]]  ;;  %s1463_s7 = sld [smem:[#allocation2 + $0x181]]  ;;  %v183_v53 = vstv %s2874_s20 }
  0x56   :  { %2882 = sst [smem:[#allocation10_spill]] %s1444_s0  ;;  %s1480_s0 = sld [smem:[#allocation2 + $0x183]]  ;;  %vm1505_vm12 = vcmp.eq.s32.totalorder %v1276_v6, %v179_v49  ;;  %vm1517_vm14 = vcmp.eq.s32.totalorder %v183_v53, 1 }
  0x57   :  { %s1478_s19 = sld [smem:[#allocation2 + $0x182]]  ;;  %s1493_s14 = sld [smem:[#allocation2 + $0x184]]  ;;  %vm185_vm2 = vmand %vm1505_vm12, %vm1517_vm14  ;;  %vm1670_vm14 = vcmp.eq.s32.totalorder %v266_v25, 1  ;;  %vm1692_vm12 = vcmp.eq.s32.totalorder %v216_v30, 1 }
  0x58   :  { %v122_v55 = vstv %s2878_s21  ;;  %v129_v56 = vstv %s2881_s8  ;;  %s1495_s20 = sld [smem:[#allocation2 + $0x185]]  ;;  %s1509_s21 = sld [smem:[#allocation2 + $0x186]]  ;;  %v939_v22 = vsel %vm185_vm2, 1.0, %v1145_v1  ;;  %vm1661_vm2 = vcmp.eq.s32.totalorder %v1276_v6, %v212_v23 }
  0x59   :  { %v133_v59 = vstv %s2885_s24  ;;  %s1511_s8 = sld [smem:[#allocation2 + $0x187]]  ;;  %s1523_s24 = sld [smem:[#allocation2 + $0x200]]  ;;  %vm1527_vm15 = vcmp.eq.s32.totalorder %v122_v55, 1  ;;  %vm1544_vm0 = vcmp.eq.s32.totalorder %v1276_v6, %v129_v56  ;;  %v188_v31 = vadd.f32 %v939_v22, %v177_v15 }
  0x5a   :  { %s1525_s2 = sld [smem:[#allocation2 + $0x201]]  ;;  %s1539_s9 = sld [smem:[#allocation2 + $0x202]]  ;;  %vm1558_vm1 = vcmp.eq.s32.totalorder %v133_v59, 1  ;;  %vm124_vm5 = vmand %vm1483_vm10, %vm1527_vm15  ;;  %vm1645_vm10 = vcmp.eq.s32.totalorder %v205_v19, 1  ;;  %v2917_v32 = vsel %vm1661_vm2, 4294967295, %v2916_v32 }
  0x5b   :  { %s1541_s26 = sld [smem:[#allocation2 + $0x203]]  ;;  %p336_p6 = scmp.ne.s32.totalorder %s1461_s1, 0  ;;  %v928_v26 = vsel %vm124_vm5, 1.0, %v1145_v1  ;;  %vm1666_vm5 = vcmp.eq.s32.totalorder %v1276_v6, %v262_v24  ;;  %vm207_vm15 = vmand %vm1641_vm13, %vm1645_vm10  ;;  %v199_v49 = vadd.f32 %v941_v39, %v188_v31  ;;  %vm2933_vm8 = vnez %v2917_v32 }
  0x5c   :  { %p347_p7 = scmp.ne.s32.totalorder %s1463_s7, 0  ;;  %p369_p9 = scmp.ne.s32.totalorder %s1480_s0, 0  ;;  %vm2924_vm2 = vmand %vm1582_vm6, %vm1586_vm7  ;;  %v127_v43 = vadd.f32 %v928_v26, %v116_v27  ;;  %vm1727_vm7 = vcmp.eq.s32.totalorder %v1276_v6, %v223_v35  ;;  %v943_v53 = vsel %vm207_vm15, 1.0, %v1145_v1  ;;  %v334_v55 = vstv %s1461_s1 }
  0x5d   :  { %p358_p8 = scmp.ne.s32.totalorder %s1478_s19, 0  ;;  %p380_p10 = scmp.ne.s32.totalorder %s1493_s14, 0  ;;  %v950_v41 = vsel %vm2924_vm2, 1.0, %v1145_v1  ;;  %vm2926_vm4 = vmand %vm1544_vm0, %vm1558_vm1  ;;  %vm1733_vm0 = vcmp.eq.s32.totalorder %v1276_v6, %v273_v36  ;;  %vm1737_vm1 = vcmp.eq.s32.totalorder %v277_v37, 1  ;;  %v345_v59 = vstv %s1463_s7 }
  0x5e   :  { %s1592_s4 = scalar_select %p336_p6, 1, 0  ;;  %v930_v44 = vsel %vm2926_vm4, 1.0, %v1145_v1  ;;  %vm268_vm6 = vmand %vm1666_vm5, %vm1670_vm14  ;;  %v260_v50 = vadd.f32 %v952_v42, %v950_v41  ;;  %vm1768_vm14 = vcmp.eq.s32.totalorder %v227_v46, 1  ;;  %vm1787_vm13 = vcmp.eq.s32.totalorder %v288_v52, 1 }
  0x5f   :  { %s1607_s16 = scalar_select %p347_p7, 1, 0  ;;  %vm218_vm9 = vmand %vm2933_vm8, %vm1692_vm12  ;;  %v954_v54 = vsel %vm268_vm6, 1.0, %v1145_v1  ;;  %v210_v2 = vadd.f32 %v943_v53, %v199_v49  ;;  %vm1798_vm10 = vcmp.eq.s32.totalorder %v1276_v6, %v334_v55  ;;  %vm1821_vm5 = vcmp.eq.s32.totalorder %v1276_v6, %v345_v59 }
  0x60   :  { %s1624_s5 = scalar_select %p358_p8, 1, 0  ;;  %v338_v56 = vstv %s1592_s4  ;;  %vm279_vm2 = vmand %vm1733_vm0, %vm1737_vm1  ;;  %v945_v61 = vsel %vm218_vm9, 1.0, %v1145_v1  ;;  %v271_v3 = vadd.f32 %v954_v54, %v260_v50  ;;  %v356_v10 = vstv %s1478_s19 }
  0x61   :  { %s1638_s3 = scalar_select %p369_p9, 1, 0  ;;  %v349_v60 = vstv %s1607_s16  ;;  %vm1802_vm12 = vcmp.eq.s32.totalorder %v338_v56, 1  ;;  %vm229_vm15 = vmand %vm1727_vm7, %vm1768_vm14  ;;  %v956_v7 = vsel %vm279_vm2, 1.0, %v1145_v1  ;;  %vm1839_vm6 = vcmp.eq.s32.totalorder %v1276_v6, %v295_v58 }
  0x62   :  { %p391_p11 = scmp.ne.s32.totalorder %s1495_s20, 0  ;;  %p402_p12 = scmp.ne.s32.totalorder %s1509_s21, 0  ;;  %vm1825_vm3 = vcmp.eq.s32.totalorder %v349_v60, 1  ;;  %vm290_vm4 = vmand %vm1750_vm11, %vm1787_vm13  ;;  %vm1843_vm0 = vcmp.eq.s32.totalorder %v299_v63, 1  ;;  %v360_v13 = vstv %s1624_s5  ;;  %v1852_v14 = vadd.f32 %v930_v44, %v127_v43 }
  0x63   :  { %p413_p13 = scmp.ne.s32.totalorder %s1511_s8, 0  ;;  %p430_p0 = scmp.ne.s32.totalorder %s1523_s24, 0  ;;  %vm1855_vm1 = vcmp.eq.s32.totalorder %v1276_v6, %v306_v0  ;;  %vm340_vm8 = vmand %vm1798_vm10, %vm1802_vm12  ;;  %v221_v18 = vadd.f32 %v945_v61, %v210_v2  ;;  %v947_v19 = vsel %vm229_vm15, 1.0, %v1145_v1  ;;  %v282_v20 = vadd.f32 %v956_v7, %v271_v3 }
  0x64   :  { %s1680_s6 = scalar_select %p380_p10, 1, 0  ;;  %vm351_vm9 = vmand %vm1821_vm5, %vm1825_vm3  ;;  %vm1880_vm2 = vcmp.eq.s32.totalorder %v1276_v6, %v356_v10  ;;  %vm1892_vm14 = vcmp.eq.s32.totalorder %v360_v13, 1  ;;  %v367_v23 = vstv %s1480_s0  ;;  %v371_v24 = vstv %s1638_s3 }
  0x65   :  { %s1710_s10 = scalar_select %p391_p11, 1, 0  ;;  %v958_v25 = vsel %vm290_vm4, 1.0, %v1145_v1  ;;  %v428_v27 = vstv %s1523_s24  ;;  %v967_v30 = vsel %vm340_vm8, 1.0, %v1145_v1  ;;  %v969_v31 = vsel %vm351_vm9, 1.0, %v1145_v1  ;;  %vm2963_vm11 = vmand %vm1839_vm6, %vm1843_vm0 }
  0x66   :  { %s1724_s23 = scalar_select %p402_p12, 1, 0  ;;  %v439_v32 = vstv %s1525_s2  ;;  %v960_v34 = vsel %vm2963_vm11, 1.0, %v1145_v1  ;;  %vm362_vm13 = vmand %vm1880_vm2, %vm1892_vm14  ;;  %vm1948_vm10 = vcmp.eq.s32.totalorder %v1276_v6, %v367_v23  ;;  %vm1952_vm12 = vcmp.eq.s32.totalorder %v371_v24, 1 }
  0x67   :  { %s1743_s15 = scalar_select %p413_p13, 1, 0  ;;  %v293_v38 = vadd.f32 %v958_v25, %v282_v20  ;;  %v378_v39 = vstv %s1493_s14  ;;  %vm1960_vm5 = vcmp.eq.s32.totalorder %v1276_v6, %v428_v27  ;;  %v354_v42 = vadd.f32 %v969_v31, %v967_v30 }
  0x68   :  { %p441_p1 = scmp.ne.s32.totalorder %s1525_s2, 0  ;;  %p452_p2 = scmp.ne.s32.totalorder %s1539_s9, 0  ;;  %v382_v43 = vstv %s1680_s6  ;;  %vm1976_vm6 = vcmp.eq.s32.totalorder %v1276_v6, %v439_v32  ;;  %v971_v47 = vsel %vm362_vm13, 1.0, %v1145_v1  ;;  %v450_v48 = vstv %s1539_s9 }
  0x69   :  { %p463_p3 = scmp.ne.s32.totalorder %s1541_s26, 0  ;;  %s2944_s28 = sld [smem:[#allocation8_spill]]  ;;  %v232_v50 = vadd.f32 %v947_v19, %v221_v18  ;;  %v389_v52 = vstv %s1495_s20  ;;  %v393_v53 = vstv %s1710_s10  ;;  %v304_v54 = vadd.f32 %v960_v34, %v293_v38 }
  0x6a   :  { %s1779_s27 = scalar_select %p430_p0, 1, 0  ;;  %vm2022_vm14 = vcmp.eq.s32.totalorder %v1276_v6, %v378_v39  ;;  %vm2026_vm13 = vcmp.eq.s32.totalorder %v382_v43, 1  ;;  %v400_v57 = vstv %s1509_s21  ;;  %v365_v58 = vadd.f32 %v971_v47, %v354_v42 }
  0x6b   :  { %s1795_s22 = scalar_select %p441_p1, 1, 0  ;;  %v404_v59 = vstv %s1724_s23  ;;  %vm2041_vm2 = vcmp.eq.s32.totalorder %v1276_v6, %v450_v48  ;;  %v2984_v60 = vmov 0  ;;  %v2986_v61 = vmov 0 }
  0x6c   :  { %s1808_s17 = scalar_select %p452_p2, 1, 0  ;;  %v432_v28 = vstv %s1779_s27  ;;  %v2985_v60 = vsel %vm2041_vm2, 4294967295, %v2984_v60  ;;  %vm2988_vm2 = vmand %vm1948_vm10, %vm1952_vm12  ;;  %v461_v5 = vstv %s1541_s26  ;;  %v411_v15 = vstv %s1511_s8 }
  0x6d   :  { %s2945_s25 = sld [smem:[#allocation14_spill]]  ;;  %s1848_s18 = sld [smem:[#allocation2 + $0x204]]  ;;  %v443_v33 = vstv %s1795_s22  ;;  %vm1964_vm3 = vcmp.eq.s32.totalorder %v432_v28, 1  ;;  %v973_v63 = vsel %vm2988_vm2, 1.0, %v1145_v1  ;;  %vm3000_vm2 = vnez %v2985_v60 }
  0x6e   :  { %s1832_s29 = scalar_select %p463_p3, 1, 0  ;;  %vm1980_vm0 = vcmp.eq.s32.totalorder %v443_v33, 1  ;;  %v454_v49 = vstv %s1808_s17  ;;  %vm2993_vm10 = vmand %vm1960_vm5, %vm1964_vm3  ;;  %vm2102_vm5 = vcmp.eq.s32.totalorder %v404_v59, 1  ;;  %v376_v13 = vadd.f32 %v973_v63, %v365_v58 }
  0x6f   :  { %s1850_s30 = sld [smem:[#allocation2 + $0x205]]  ;;  %v310_v16 = vstv %s2944_s28  ;;  %s1865_s11 = sld [smem:[#allocation2 + $0x206]]  ;;  %vm2045_vm9 = vcmp.eq.s32.totalorder %v454_v49, 1  ;;  %v984_v3 = vsel %vm2993_vm10, 1.0, %v1145_v1  ;;  %vm2994_vm12 = vmand %vm1976_vm6, %vm1980_vm0  ;;  %vm3001_vm0 = vcmask 1040384  }
  0x70   :  { %s1867_s12 = sld [smem:[#allocation2 + $0x207]]  ;;  %s1884_s13 = sld [smem:[#allocation2 + $0x280]]  ;;  %vm1908_vm15 = vcmp.eq.s32.totalorder %v310_v16, 1  ;;  %v2987_v61 = vsel %vm2045_vm9, 4294967295, %v2986_v61  ;;  %vm2068_vm9 = vcmp.eq.s32.totalorder %v1276_v6, %v389_v52  ;;  %v986_v4 = vsel %vm2994_vm12, 1.0, %v1145_v1 }
  0x71   :  { %s1886_s1 = sld [smem:[#allocation2 + $0x281]]  ;;  %s1898_s7 = sld [smem:[#allocation2 + $0x282]]  ;;  %vm312_vm4 = vmand %vm1855_vm1, %vm1908_vm15  ;;  %vm2072_vm1 = vcmp.eq.s32.totalorder %v393_v53, 1  ;;  %vm2999_vm3 = vnez %v2987_v61  ;;  %v465_v9 = vstv %s1832_s29  ;;  %v2117_v10 = vsel %vm3001_vm0, %v1852_v14, %v232_v50 }
  0x72   :  { %s1900_s19 = sld [smem:[#allocation2 + $0x283]]  ;;  %s2960_s4 = sld [smem:[#allocation10_spill]]  ;;  %v962_v62 = vsel %vm312_vm4, 1.0, %v1145_v1  ;;  %vm384_vm15 = vmand %vm2022_vm14, %vm2026_vm13  ;;  %vm2098_vm4 = vcmp.eq.s32.totalorder %v1276_v6, %v400_v57  ;;  %v415_v16 = vstv %s1743_s15  ;;  %v3072_v60 = vmov 0 }
  0x73   :  { %v317_v17 = vstv %s2945_s25  ;;  %s1914_s0 = sld [smem:[#allocation2 + $0x284]]  ;;  %s1916_s16 = sld [smem:[#allocation2 + $0x285]]  ;;  %vm456_vm6 = vmand %vm3000_vm2, %vm2999_vm3  ;;  %v315_v11 = vadd.f32 %v962_v62, %v304_v54  ;;  %v975_v14 = vsel %vm384_vm15, 1.0, %v1145_v1  ;;  %v472_v21 = vstv %s1848_s18 }
  0x74   :  { %s1932_s24 = sld [smem:[#allocation2 + $0x286]]  ;;  %s1934_s5 = sld [smem:[#allocation2 + $0x287]]  ;;  %vm1987_vm8 = vcmp.eq.s32.totalorder %v1276_v6, %v317_v17  ;;  %vm395_vm10 = vmand %vm2068_vm9, %vm2072_vm1  ;;  %v448_v17 = vadd.f32 %v986_v4, %v984_v3  ;;  %v988_v19 = vsel %vm456_vm6, 1.0, %v1145_v1  ;;  %vm2160_vm9 = vcmp.eq.s32.totalorder %v465_v9, 1 }
  0x75   :  { %p474_p4 = scmp.ne.s32.totalorder %s1848_s18, 0  ;;  %p485_p5 = scmp.ne.s32.totalorder %s1850_s30, 0  ;;  %v977_v23 = vsel %vm395_vm10, 1.0, %v1145_v1  ;;  %v387_v27 = vadd.f32 %v975_v14, %v376_v13  ;;  %vm2178_vm14 = vcmp.eq.s32.totalorder %v415_v16, 1  ;;  %vm2197_vm1 = vcmp.eq.s32.totalorder %v1276_v6, %v472_v21 }
  0x76   :  { %p496_p6 = scmp.ne.s32.totalorder %s1865_s11, 0  ;;  %p507_p7 = scmp.ne.s32.totalorder %s1867_s12, 0  ;;  %v522_v25 = vstv %s1884_s13  ;;  %v459_v32 = vadd.f32 %v988_v19, %v448_v17  ;;  %v494_v39 = vstv %s1865_s11  ;;  %v505_v4 = vstv %s1867_s12 }
  0x77   :  { %s1984_s14 = scalar_select %p474_p4, 1, 0  ;;  %v533_v29 = vstv %s1886_s1  ;;  %vm2212_vm12 = vcmp.eq.s32.totalorder %v1276_v6, %v522_v25  ;;  %v398_v43 = vadd.f32 %v977_v23, %v387_v27  ;;  %v544_v45 = vstv %s1898_s7 }
  0x78   :  { %v321_v35 = vstv %s2960_s4  ;;  %s2005_s2 = scalar_select %p485_p5, 1, 0  ;;  %vm2231_vm3 = vcmp.eq.s32.totalorder %v1276_v6, %v533_v29  ;;  %v555_v49 = vstv %s1900_s19 }
  0x79   :  { %vm2007_vm11 = vcmp.eq.s32.totalorder %v321_v35, 1  ;;  %s2019_s9 = scalar_select %p496_p6, 1, 0  ;;  %v476_v22 = vstv %s1984_s14  ;;  %v483_v35 = vstv %s1850_s30  ;;  %v566_v58 = vstv %s1914_s0 }
  0x7a   :  { %s2037_s20 = scalar_select %p507_p7, 1, 0  ;;  %vm323_vm7 = vmand %vm1987_vm8, %vm2007_vm11  ;;  %vm2170_vm11 = vcmp.eq.s32.totalorder %v1276_v6, %v411_v15  ;;  %vm2201_vm15 = vcmp.eq.s32.totalorder %v476_v22, 1  ;;  %v487_v36 = vstv %s2005_s2  ;;  %vm2260_vm0 = vcmp.eq.s32.totalorder %v1276_v6, %v483_v35 }
  0x7b   :  { %p524_p8 = scmp.ne.s32.totalorder %s1884_s13, 0  ;;  %p535_p9 = scmp.ne.s32.totalorder %s1886_s1, 0  ;;  %v964_v12 = vsel %vm323_vm7, 1.0, %v1145_v1  ;;  %vm2142_vm7 = vcmp.eq.s32.totalorder %v1276_v6, %v461_v5  ;;  %vm406_vm8 = vmand %vm2098_vm4, %vm2102_vm5  ;;  %v498_v40 = vstv %s2019_s9  ;;  %vm2264_vm10 = vcmp.eq.s32.totalorder %v487_v36, 1 }
  0x7c   :  { %p546_p10 = scmp.ne.s32.totalorder %s1898_s7, 0  ;;  %p557_p11 = scmp.ne.s32.totalorder %s1900_s19, 0  ;;  %v979_v31 = vsel %vm406_vm8, 1.0, %v1145_v1  ;;  %vm467_vm13 = vmand %vm2142_vm7, %vm2160_vm9  ;;  %v2278_v51 = vadd.f32 %v964_v12, %v315_v11  ;;  %vm2289_vm8 = vcmp.eq.s32.totalorder %v1276_v6, %v494_v39  ;;  %vm2293_vm9 = vcmp.eq.s32.totalorder %v498_v40, 1 }
  0x7d   :  { %s2095_s21 = scalar_select %p524_p8, 1, 0  ;;  %vm417_vm5 = vmand %vm2170_vm11, %vm2178_vm14  ;;  %v990_v44 = vsel %vm467_vm13, 1.0, %v1145_v1  ;;  %vm2306_vm11 = vcmp.eq.s32.totalorder %v1276_v6, %v544_v45  ;;  %vm2330_vm13 = vcmp.eq.s32.totalorder %v1276_v6, %v555_v49  ;;  %v577_v62 = vstv %s1916_s16 }
  0x7e   :  { %s2113_s26 = scalar_select %p535_p9, 1, 0  ;;  %vm478_vm6 = vmand %vm2197_vm1, %vm2201_vm15  ;;  %v2286_v52 = vsel %vm417_vm5, 1.0, %v1145_v1  ;;  %v470_v55 = vadd.f32 %v990_v44, %v459_v32  ;;  %v2343_v63 = vadd.f32 %v979_v31, %v398_v43  ;;  %v588_v7 = vstv %s1932_s24 }
  0x7f   :  { %s2132_s3 = scalar_select %p546_p10, 1, 0  ;;  %v526_v26 = vstv %s2095_s21  ;;  %v992_v59 = vsel %vm478_vm6, 1.0, %v1145_v1  ;;  %vm489_vm5 = vmand %vm2260_vm0, %vm2264_vm10  ;;  %v509_v11 = vstv %s2037_s20  ;;  %v599_v23 = vstv %s1934_s5 }
  0x80   :  { %s2148_s8 = scalar_select %p557_p11, 1, 0  ;;  %v537_v30 = vstv %s2113_s26  ;;  %vm2216_vm4 = vcmp.eq.s32.totalorder %v526_v26, 1  ;;  %vm500_vm1 = vmand %vm2289_vm8, %vm2293_vm9  ;;  %v481_v9 = vadd.f32 %v992_v59, %v470_v55  ;;  %v994_v15 = vsel %vm489_vm5, 1.0, %v1145_v1 }
  0x81   :  { %p568_p12 = scmp.ne.s32.totalorder %s1914_s0, 0  ;;  %p579_p13 = scmp.ne.s32.totalorder %s1916_s16, 0  ;;  %vm2235_vm2 = vcmp.eq.s32.totalorder %v537_v30, 1  ;;  %v548_v46 = vstv %s2132_s3  ;;  %vm3038_vm15 = vmand %vm2212_vm12, %vm2216_vm4  ;;  %vm2372_vm4 = vcmp.eq.s32.totalorder %v1276_v6, %v566_v58  ;;  %v2410_v18 = vsel %vm500_vm1, 1.0, %v1145_v1 }
  0x82   :  { %p590_p0 = scmp.ne.s32.totalorder %s1932_s24, 0  ;;  %p601_p1 = scmp.ne.s32.totalorder %s1934_s5, 0  ;;  %v559_v50 = vstv %s2148_s8  ;;  %vm2310_vm14 = vcmp.eq.s32.totalorder %v548_v46, 1  ;;  %v1001_v0 = vsel %vm3038_vm15, 1.0, %v1145_v1  ;;  %vm3039_vm6 = vmand %vm2231_vm3, %vm2235_vm2  ;;  %vm2386_vm2 = vcmp.eq.s32.totalorder %v1276_v6, %v577_v62 }
  0x83   :  { %s2184_s6 = scalar_select %p568_p12, 1, 0  ;;  %vm2334_vm7 = vcmp.eq.s32.totalorder %v559_v50, 1  ;;  %v1003_v2 = vsel %vm3039_vm6, 1.0, %v1145_v1  ;;  %vm550_vm12 = vmand %vm2306_vm11, %vm2310_vm14  ;;  %vm2440_vm8 = vcmp.eq.s32.totalorder %v509_v11, 1  ;;  %vm2457_vm14 = vcmp.eq.s32.totalorder %v1276_v6, %v588_v7 }
  0x84   :  { %s2207_s10 = scalar_select %p579_p13, 1, 0  ;;  %vm561_vm3 = vmand %vm2330_vm13, %vm2334_vm7  ;;  %v542_v14 = vadd.f32 %v1003_v2, %v1001_v0  ;;  %v1005_v19 = vsel %vm550_vm12, 1.0, %v1145_v1  ;;  %vm2436_vm7 = vcmp.eq.s32.totalorder %v1276_v6, %v505_v4  ;;  %v3056_v32 = vmov 0 }
  0x85   :  { %s2222_s23 = scalar_select %p590_p0, 1, 0  ;;  %v570_v3 = vstv %s2184_s6  ;;  %v1007_v22 = vsel %vm561_vm3, 1.0, %v1145_v1  ;;  %v3057_v32 = vsel %vm2457_vm14, 4294967295, %v3056_v32  ;;  %v2488_v42 = vadd.f32 %v994_v15, %v481_v9 }
  0x86   :  { %s2241_s15 = scalar_select %p601_p1, 1, 0  ;;  %vm2399_vm15 = vcmp.eq.s32.totalorder %v570_v3, 1  ;;  %v581_v28 = vstv %s2207_s10  ;;  %v553_v31 = vadd.f32 %v1005_v19, %v542_v14  ;;  %v420_v30 = vadd.f32 %v2286_v52, %v2343_v63 }
  0x87   :  { %s2255_s27 = sld [smem:[#allocation2 + $0x300]]  ;;  %s2257_s22 = sld [smem:[#allocation2 + $0x301]]  ;;  %vm572_vm9 = vmand %vm2372_vm4, %vm2399_vm15  ;;  %v592_v43 = vstv %s2222_s23  ;;  %v503_v52 = vadd.f32 %v2410_v18, %v2488_v42 }
  0x88   :  { %s2274_s28 = sld [smem:[#allocation2 + $0x302]]  ;;  %s2276_s17 = sld [smem:[#allocation2 + $0x303]]  ;;  %v564_v46 = vadd.f32 %v1007_v22, %v553_v31  ;;  %v1009_v47 = vsel %vm572_vm9, 1.0, %v1145_v1  ;;  %v603_v61 = vstv %s2241_s15 }
  0x89   :  { %s2301_s25 = sld [smem:[#allocation2 + $0x304]]  ;;  %s2303_s29 = sld [smem:[#allocation2 + $0x305]] }
  0x8a   :  { %s2315_s18 = sld [smem:[#allocation2 + $0x306]]  ;;  %s2317_s30 = sld [smem:[#allocation2 + $0x307]]  ;;  %v575_v2 = vadd.f32 %v1009_v47, %v564_v46 }
  0x8b   :  { %s2339_s11 = sld [smem:[#allocation2 + $0x380]]  ;;  %s2341_s13 = sld [smem:[#allocation2 + $0x381]] }
  0x8c   :  { %s2362_s1 = sld [smem:[#allocation2 + $0x382]]  ;;  %s2364_s7 = sld [smem:[#allocation2 + $0x383]] }
  0x8d   :  { %v616_v8 = vstv %s2255_s27  ;;  %p618_p2 = scmp.ne.s32.totalorder %s2255_s27, 0  ;;  %p629_p3 = scmp.ne.s32.totalorder %s2257_s22, 0  ;;  %v627_v13 = vstv %s2257_s22 }
  0x8e   :  { %p640_p4 = scmp.ne.s32.totalorder %s2274_s28, 0  ;;  %p651_p5 = scmp.ne.s32.totalorder %s2276_s17, 0  ;;  %v638_v17 = vstv %s2274_s28  ;;  %vm2419_vm0 = vcmp.eq.s32.totalorder %v1276_v6, %v616_v8  ;;  %v649_v21 = vstv %s2276_s17  ;;  %vm2429_vm10 = vcmp.eq.s32.totalorder %v1276_v6, %v627_v13 }
  0x8f   :  { %s619_s12 = scalar_select %p618_p2, 1, 0  ;;  %vm2450_vm11 = vcmp.eq.s32.totalorder %v1276_v6, %v638_v17  ;;  %vm2464_vm6 = vcmp.eq.s32.totalorder %v1276_v6, %v649_v21  ;;  %v660_v37 = vstv %s2301_s25  ;;  %v671_v41 = vstv %s2303_s29 }
  0x90   :  { %s630_s19 = scalar_select %p629_p3, 1, 0  ;;  %vm2522_vm15 = vcmp.eq.s32.totalorder %v1276_v6, %v671_v41  ;;  %v682_v58 = vstv %s2315_s18  ;;  %v693_v9 = vstv %s2317_s30 }
  0x91   :  { %v620_v24 = vstv %s619_s12  ;;  %s641_s4 = scalar_select %p640_p4, 1, 0  ;;  %v710_v59 = vstv %s2339_s11  ;;  %v721_v62 = vstv %s2341_s13 }
  0x92   :  { %vm621_vm13 = vcmp.eq.s32.totalorder %v620_v24, 1  ;;  %v631_v29 = vstv %s630_s19  ;;  %s652_s0 = scalar_select %p651_p5, 1, 0  ;;  %v732_v0 = vstv %s2362_s1  ;;  %v743_v5 = vstv %s2364_s7 }
  0x93   :  { %vm622_vm5 = vmand %vm2419_vm0, %vm621_vm13  ;;  %vm632_vm1 = vcmp.eq.s32.totalorder %v631_v29, 1  ;;  %v642_v33 = vstv %s641_s4  ;;  %p662_p6 = scmp.ne.s32.totalorder %s2301_s25, 0  ;;  %p673_p7 = scmp.ne.s32.totalorder %s2303_s29, 0  ;;  %vm2476_vm0 = vcmp.eq.s32.totalorder %v581_v28, 1 }
  0x94   :  { %v1018_v35 = vsel %vm622_vm5, 1.0, %v1145_v1  ;;  %vm633_vm12 = vmand %vm2429_vm10, %vm632_vm1  ;;  %vm643_vm3 = vcmp.eq.s32.totalorder %v642_v33, 1  ;;  %v653_v36 = vstv %s652_s0  ;;  %p684_p8 = scmp.ne.s32.totalorder %s2315_s18, 0  ;;  %p695_p9 = scmp.ne.s32.totalorder %s2317_s30, 0 }
  0x95   :  { %v1020_v39 = vsel %vm633_vm12, 1.0, %v1145_v1  ;;  %vm644_vm13 = vmand %vm2450_vm11, %vm643_vm3  ;;  %vm2483_vm5 = vcmp.eq.s32.totalorder %v653_v36, 1  ;;  %s663_s16 = scalar_select %p662_p6, 1, 0  ;;  %vm2505_vm11 = vcmp.eq.s32.totalorder %v1276_v6, %v660_v37  ;;  %vm2539_vm12 = vcmp.eq.s32.totalorder %v592_v43, 1 }
  0x96   :  { %v636_v44 = vadd.f32 %v1020_v39, %v1018_v35  ;;  %v1022_v45 = vsel %vm644_vm13, 1.0, %v1145_v1  ;;  %vm655_vm10 = vmand %vm2464_vm6, %vm2483_vm5  ;;  %s674_s24 = scalar_select %p673_p7, 1, 0  ;;  %v3073_v60 = vsel %vm2539_vm12, 4294967295, %v3072_v60  ;;  %vm2565_vm5 = vcmp.eq.s32.totalorder %v1276_v6, %v682_v58 }
  0x97   :  { %v664_v49 = vstv %s663_s16  ;;  %s2511_s14 = scalar_select %p684_p8, 1, 0  ;;  %vm583_vm1 = vmand %vm2386_vm2, %vm2476_vm0  ;;  %v1024_v56 = vsel %vm655_vm10, 1.0, %v1145_v1  ;;  %vm2571_vm2 = vcmp.eq.s32.totalorder %v1276_v6, %v710_v59  ;;  %vm2588_vm10 = vcmp.eq.s32.totalorder %v1276_v6, %v721_v62 }
  0x98   :  { %v647_v50 = vadd.f32 %v1022_v45, %v636_v44  ;;  %vm2517_vm4 = vcmp.eq.s32.totalorder %v664_v49, 1  ;;  %v675_v55 = vstv %s674_s24  ;;  %s2528_s2 = scalar_select %p695_p9, 1, 0  ;;  %v1011_v3 = vsel %vm583_vm1, 1.0, %v1145_v1 }
  0x99   :  { %vm2531_vm9 = vcmp.eq.s32.totalorder %v675_v55, 1  ;;  %p712_p10 = scmp.ne.s32.totalorder %s2339_s11, 0  ;;  %p723_p11 = scmp.ne.s32.totalorder %s2341_s13, 0  ;;  %vm666_vm3 = vmand %vm2505_vm11, %vm2517_vm4  ;;  %v686_v4 = vstv %s2511_s14  ;;  %vm2593_vm1 = vcmp.eq.s32.totalorder %v1276_v6, %v732_v0  ;;  %v586_v36 = vadd.f32 %v1011_v3, %v575_v2 }
  0x9a   :  { %p734_p12 = scmp.ne.s32.totalorder %s2362_s1, 0  ;;  %p745_p13 = scmp.ne.s32.totalorder %s2364_s7, 0  ;;  %v658_v7 = vadd.f32 %v1024_v56, %v647_v50  ;;  %vm677_vm13 = vmand %vm2522_vm15, %vm2531_vm9  ;;  %v1026_v12 = vsel %vm666_vm3, 1.0, %v1145_v1  ;;  %vm2603_vm11 = vcmp.eq.s32.totalorder %v686_v4, 1  ;;  %vm2608_vm3 = vcmp.eq.s32.totalorder %v1276_v6, %v743_v5 }
  0x9b   :  { %s713_s9 = scalar_select %p712_p10, 1, 0  ;;  %v1028_v20 = vsel %vm677_vm13, 1.0, %v1145_v1  ;;  %v697_v21 = vstv %s2528_s2  ;;  %vm2643_vm15 = vcmp.eq.s32.totalorder %v1276_v6, %v599_v23  ;;  %vm2662_vm13 = vcmp.eq.s32.totalorder %v603_v61, 1 }
  0x9c   :  { %s724_s20 = scalar_select %p723_p11, 1, 0  ;;  %v669_v24 = vadd.f32 %v1026_v12, %v658_v7 }
  0x9d   :  { %v714_v13 = vstv %s713_s9  ;;  %s735_s21 = scalar_select %p734_p12, 1, 0 }
  0x9e   :  { %vm715_vm4 = vcmp.eq.s32.totalorder %v714_v13, 1  ;;  %v725_v17 = vstv %s724_s20  ;;  %s746_s26 = scalar_select %p745_p13, 1, 0  ;;  %v680_v27 = vadd.f32 %v1028_v20, %v669_v24 }
  0x9f   :  { %vm716_vm6 = vmand %vm2571_vm2, %vm715_vm4  ;;  %vm726_vm0 = vcmp.eq.s32.totalorder %v725_v17, 1  ;;  %v736_v22 = vstv %s735_s21  ;;  %s2623_s3 = sld [smem:[#allocation2 + $0x384]]  ;;  %s2625_s8 = sld [smem:[#allocation2 + $0x385]]  ;;  %vm2682_vm2 = vcmp.eq.s32.totalorder %v1276_v6, %v693_v9  ;;  %vm3102_vm4 = vcmask 1041408  }
  0xa0   :  { %v1035_v25 = vsel %vm716_vm6, 1.0, %v1145_v1  ;;  %vm727_vm12 = vmand %vm2588_vm10, %vm726_vm0  ;;  %vm2630_vm14 = vcmp.eq.s32.totalorder %v736_v22, 1  ;;  %v747_v29 = vstv %s746_s26  ;;  %s2634_s6 = sld [smem:[#allocation2 + $0x386]]  ;;  %s2636_s10 = sld [smem:[#allocation2 + $0x387]]  ;;  %vm2686_vm0 = vcmp.eq.s32.totalorder %v697_v21, 1 }
  0xa1   :  { %v1037_v33 = vsel %vm727_vm12, 1.0, %v1145_v1  ;;  %vm738_vm9 = vmand %vm2593_vm1, %vm2630_vm14  ;;  %vm2652_vm6 = vcmp.eq.s32.totalorder %v747_v29, 1  ;;  %s2656_s23 = sld [smem:[#allocation4]]  ;;  %v800_v39 = vsel %vm3102_vm4, %v2117_v10, %v2278_v51 }
  0xa2   :  { %s2658_s15 = sld [smem:[#allocation4 + $0x80]]  ;;  %vm688_vm14 = vmand %vm2565_vm5, %vm2603_vm11  ;;  %v730_v23 = vadd.f32 %v1037_v33, %v1035_v25  ;;  %v1039_v35 = vsel %vm738_vm9, 1.0, %v1145_v1  ;;  %vm801_vm9 = vcmask 1042432   ;;  %vm805_vm5 = vcmask 1044480  }
  0xa3   :  { %s2671_s5 = sld [smem:[#allocation4 + $0x100]]  ;;  %vm3094_vm12 = vmand %vm2436_vm7, %vm2440_vm8  ;;  %vm3099_vm7 = vnez %v3057_v32  ;;  %vm3100_vm8 = vnez %v3073_v60  ;;  %v1030_v32 = vsel %vm688_vm14, 1.0, %v1145_v1  ;;  %v802_v45 = vsel %vm801_vm9, %v800_v39, %v420_v30 }
  0xa4   :  { %s2673_s27 = sld [smem:[#allocation4 + $0x180]]  ;;  %v998_v18 = vsel %vm3094_vm12, 1.0, %v1145_v1  ;;  %vm749_vm10 = vmand %vm2608_vm3, %vm2652_vm6  ;;  %v741_v10 = vadd.f32 %v1039_v35, %v730_v23  ;;  %vm807_vm11 = vcmask 1045504   ;;  %v691_v47 = vadd.f32 %v1030_v32, %v680_v27 }
  0xa5   :  { %s2694_s22 = sld [smem:[#allocation4 + $0x200]]  ;;  %vm3101_vm1 = vmand %vm3099_vm7, %vm3100_vm8  ;;  %v754_v51 = vstv %s2623_s3  ;;  %p756_p0 = scmp.ne.s32.totalorder %s2623_s3, 0  ;;  %vm803_vm7 = vcmask 1043456   ;;  %v514_v40 = vadd.f32 %v998_v18, %v503_v52  ;;  %v1041_v41 = vsel %vm749_vm10, 1.0, %v1145_v1 }
  0xa6   :  { %s2696_s28 = sld [smem:[#allocation4 + $0x280]]  ;;  %v1013_v26 = vsel %vm3101_vm1, 1.0, %v1145_v1  ;;  %vm605_vm12 = vmand %vm2643_vm15, %vm2662_vm13  ;;  %p767_p1 = scmp.ne.s32.totalorder %s2625_s8, 0  ;;  %v765_v42 = vstv %s2625_s8  ;;  %v776_v44 = vstv %s2634_s6  ;;  %vm2746_vm3 = vcmp.eq.s32.totalorder %v1276_v6, %v754_v51 }
  0xa7   :  { %s2707_s17 = sld [smem:[#allocation4 + $0x300]]  ;;  %vm699_vm8 = vmand %vm2682_vm2, %vm2686_vm0  ;;  %p778_p2 = scmp.ne.s32.totalorder %s2634_s6, 0  ;;  %v597_v43 = vadd.f32 %v1013_v26, %v586_v36  ;;  %v1015_v46 = vsel %vm605_vm12, 1.0, %v1145_v1  ;;  %v787_v49 = vstv %s2636_s10  ;;  %v752_v53 = vadd.f32 %v1041_v41, %v741_v10 }
  0xa8   :  { %s2709_s25 = sld [smem:[#allocation4 + $0x380]]  ;;  %p789_p3 = scmp.ne.s32.totalorder %s2636_s10, 0  ;;  %v1032_v50 = vsel %vm699_vm8, 1.0, %v1145_v1  ;;  %vm2760_vm15 = vcmp.eq.s32.totalorder %v1276_v6, %v765_v42  ;;  %vm2767_vm13 = vcmp.eq.s32.totalorder %v1276_v6, %v776_v44  ;;  %v804_v58 = vsel %vm803_vm7, %v802_v45, %v514_v40 }
  0xa9   :  { %s757_s29 = scalar_select %p756_p0, 1, 0  ;;  %v608_v59 = vadd.f32 %v1015_v46, %v597_v43  ;;  %vm2777_vm0 = vcmp.eq.s32.totalorder %v1276_v6, %v787_v49  ;;  %v702_v62 = vadd.f32 %v1032_v50, %v691_v47 }
  0xaa   :  { %s768_s18 = scalar_select %p767_p1, 1, 0 }
  0xab   :  { %v758_v54 = vstv %s757_s29  ;;  %s779_s30 = scalar_select %p778_p2, 1, 0  ;;  %v806_v12 = vsel %vm805_vm5, %v804_v58, %v608_v59 }
  0xac   :  { %vm759_vm6 = vcmp.eq.s32.totalorder %v758_v54, 1  ;;  %v769_v56 = vstv %s768_s18  ;;  %s790_s11 = scalar_select %p789_p3, 1, 0  ;;  %v808_v20 = vsel %vm807_vm11, %v806_v12, %v702_v62 }
  0xad   :  { %vm760_vm14 = vmand %vm2746_vm3, %vm759_vm6  ;;  %vm770_vm2 = vcmp.eq.s32.totalorder %v769_v56, 1  ;;  %v780_v60 = vstv %s779_s30  ;;  %s46_s13 = scvt.s32.f32 %s2656_s23  ;;  %s140_s1 = scvt.s32.f32 %s2658_s15  ;;  %vm809_vm3 = vcmask 1046528   ;;  %vm3113_vm6 = vcmask 1040384  }
  0xae   :  { %v1043_v0 = vsel %vm760_vm14, 1.0, %v1145_v1  ;;  %vm771_vm10 = vmand %vm2760_vm15, %vm770_vm2  ;;  %vm781_vm1 = vcmp.eq.s32.totalorder %v780_v60, 1  ;;  %v791_v2 = vstv %s790_s11  ;;  %s234_s7 = scvt.s32.f32 %s2671_s5  ;;  %s328_s12 = scvt.s32.f32 %s2673_s27  ;;  %vm851_vm15 = vcmask 523264  }
  0xaf   :  { %v763_v3 = vadd.f32 %v1043_v0, %v752_v53  ;;  %v1045_v6 = vsel %vm771_vm10, 1.0, %v1145_v1  ;;  %vm782_vm4 = vmand %vm2767_vm13, %vm781_vm1  ;;  %vm2791_vm12 = vcmp.eq.s32.totalorder %v791_v2, 1  ;;  %v47_v5 = vstv %s46_s13  ;;  %s422_s19 = scvt.s32.f32 %s2694_s22  ;;  %s516_s4 = scvt.s32.f32 %s2696_s28 }
  0xb0   :  { %v1047_v7 = vsel %vm782_vm4, 1.0, %v1145_v1  ;;  %vm793_vm8 = vmand %vm2777_vm0, %vm2791_vm12  ;;  %1099 = vrcp.f32 %v47_v5  ;;  %v141_v8 = vstv %s140_s1  ;;  %v235_v9 = vstv %s234_s7  ;;  %s610_s0 = scvt.s32.f32 %s2707_s17  ;;  %s704_s16 = scvt.s32.f32 %s2709_s25 }
  0xb1   :  { %v774_v11 = vadd.f32 %v1045_v6, %v763_v3  ;;  %1101 = vrcp.f32 %v141_v8  ;;  %v329_v13 = vstv %s328_s12  ;;  %v1049_v15 = vsel %vm793_vm8, 1.0, %v1145_v1  ;;  %s3115_s10 = sld [smem:[#allocation15_spill]]  ;;  %s3116_s5 = sld [smem:[#allocation16_spill]] }
  0xb2   :  { %1103 = vrcp.f32 %v235_v9  ;;  %v423_v14 = vstv %s422_s19  ;;  %v517_v16 = vstv %s516_s4  ;;  %v611_v19 = vstv %s610_s0 }
  0xb3   :  { %v785_v17 = vadd.f32 %v1047_v7, %v774_v11  ;;  %1105 = vrcp.f32 %v329_v13  ;;  %v705_v21 = vstv %s704_s16  ;;  %vm3114_vm13 = vcmask 1041408  }
  0xb4   :  { %1107 = vrcp.f32 %v423_v14 }
  0xb5   :  { %v796_v22 = vadd.f32 %v1049_v15, %v785_v17  ;;  %1109 = vrcp.f32 %v517_v16 }
  0xb6   :  { %1111 = vrcp.f32 %v611_v19 }
  0xb7   :  { %v810_v24 = vsel %vm809_vm3, %v808_v20, %v796_v22  ;;  %1113 = vrcp.f32 %v705_v21  ;;  %v1055_v44 = vld [vmem:[%s3115_s10] ss:$0 sm:$0xff] }
  0xb8   :  { %v818_v25 = vpack.c.bf16 %v810_v24, %v810_v24 }
  0xba   :  { %v1100_v1 = vpop.eup %1099  ;;  %1070 = vmatmul.mubr.msk.bf16.vlgmr.msra.gmra.mrb[0].mxu0 %vm851_vm15, %v818_v25 }
  0xbb   :  { %v1102_v28 = vpop.eup %1101  ;;  %1073 = vpush %v1100_v1 }
  0xbc   :  { %v1104_v29 = vpop.eup %1103  ;;  %1075 = vpush %v1102_v28 }
  0xbd   :  { %v1106_v30 = vpop.eup %1105  ;;  %1077 = vpush %v1104_v29 }
  0xbe   :  { %v1108_v31 = vpop.eup %1107  ;;  %1079 = vpush %v1106_v30 }
  0xbf   :  { %v1110_v33 = vpop.eup %1109  ;;  %1081 = vpush %v1108_v31 }
  0xc0   :  { %v1112_v34 = vpop.eup %1111  ;;  %1083 = vpush %v1110_v33 }
  0xc1   :  { %v1114_v52 = vpop.eup %1113  ;;  %1085 = vpush %v1112_v34 }
  0xc2   :  { %1087 = vpush %v1114_v52 }
  0xec   :  { %s1074_s24 = spop %1073 }
  0xed   :  { %v50_v63 = vstv %s1074_s24  ;;  %s1076_s14 = spop %1075 }
  0xee   :  { %v144_v23 = vstv %s1076_s14  ;;  %s1078_s2 = spop %1077 }
  0xef   :  { %v811_v35 = vsel %vm3113_vm6, %v50_v63, %v144_v23  ;;  %v238_v18 = vstv %s1078_s2  ;;  %s1080_s9 = spop %1079 }
  0xf0   :  { %v812_v36 = vsel %vm3114_vm13, %v811_v35, %v238_v18  ;;  %v332_v37 = vstv %s1080_s9  ;;  %s1082_s20 = spop %1081 }
  0xf1   :  { %v813_v38 = vsel %vm801_vm9, %v812_v36, %v332_v37  ;;  %v426_v26 = vstv %s1082_s20  ;;  %s1084_s21 = spop %1083 }
  0xf2   :  { %v814_v27 = vsel %vm803_vm7, %v813_v38, %v426_v26  ;;  %v520_v39 = vstv %s1084_s21  ;;  %s1086_s26 = spop %1085 }
  0xf3   :  { %v815_v32 = vsel %vm805_vm5, %v814_v27, %v520_v39  ;;  %v614_v10 = vstv %s1086_s26  ;;  %s1088_s3 = spop %1087 }
  0xf4   :  { %v708_v51 = vstv %s1088_s3  ;;  %v816_v40 = vsel %vm807_vm11, %v815_v32, %v614_v10 }
  0xf5   :  { %v817_v41 = vsel %vm809_vm3, %v816_v40, %v708_v51 }
  0xf6   :  { %897 = vperm.xlu0 %1094, %v817_v41  }
 0x175   :  { %v898_v42 = vpop.permute.xlu0 %897 }
 0x18d   :  { %v889_v43 = vpop.f32.mrb[0].mxu0 }
 0x18e   :  { %v900_v45 = vmul.f32 %v898_v42, %v889_v43  ;;  %v1071_v46 = vpop.f32.mrb[1].mxu0 }
 0x18f   :  { %v892_v47 = vpop.f32.mrb[2].mxu0 }
 0x190   :  { %v908_v48 = vadd.f32 %v1055_v44, %v900_v45  ;;  %v1072_v49 = vpop.f32.mrb[3].mxu0 }
 0x192   :  { %909 = vst [vmem:[%s3116_s5] sm:$0xff] %v908_v48 }
 0x193   :  { %914 = vsyncpa [#allocation3], 1 }
 0x194   :  { %915 = vsyncpa [#allocation5], 1 }

</bundles_post_ra>
